<compile_context>
chip_gen: v5e
topology: v5e:2x2
jax: 0.10.0
libtpu: 0.0.40
codegen_flags: <defaults>
</compile_context>

<pallas_src>
import jax
import jax.numpy as jnp
from jax.experimental import pallas as pl
from jax.experimental.pallas import tpu as pltpu


def _softplus(x):
    # numerically stable softplus built from basic VPU/EUP ops
    return jnp.maximum(x, 0.0) + jnp.log(1.0 + jnp.exp(-jnp.abs(x)))


def _silu(x):
    return x * jax.nn.sigmoid(x)


# --------------------------------------------------------------------------
# Fused MambaModule kernel: one grid step = one batch element, full sequence.
# --------------------------------------------------------------------------
def mamba_module_kernel(x_ref, gamma_ref, win_ref, wconv_ref, bconv_ref,
                        wxdt_ref, wxb_ref, wxc_ref, wdt_ref, bdt_ref,
                        alogT_ref, dpar_ref, wout_ref, out_ref):
    x = x_ref[0].astype(jnp.float32)                     # (L, D)
    L, D = x.shape
    d_conv, d_inner = wconv_ref.shape
    d_state = alogT_ref.shape[0]

    # ---- RMSNorm:  F.normalize(x, dim=-1) * sqrt(D) * gamma ----
    ssq = jnp.sum(x * x, axis=-1, keepdims=True)                      # (L, 1)
    inv = (float(D) ** 0.5) / jnp.maximum(jnp.sqrt(ssq), 1e-12)
    xn = x * inv * gamma_ref[...]                                      # (L, D)

    # ---- in_proj -> conv branch / gate branch (128-lane aligned split) ----
    xz = jnp.dot(xn, win_ref[...], preferred_element_type=jnp.float32)  # (L, 2*d_inner)
    xin = xz[:, :d_inner]
    z = xz[:, d_inner:]

    # ---- depthwise causal Conv1d (padding = d_conv-1, keep first L) + SiLU ----
    conv = jnp.zeros((L, d_inner), jnp.float32)
    for k in range(d_conv):
        off = (d_conv - 1) - k
        if off == 0:
            shifted = xin
        else:
            shifted = jnp.concatenate(
                [jnp.zeros((off, d_inner), jnp.float32), xin[:L - off, :]], axis=0)
        conv = conv + wconv_ref[k:k + 1, :] * shifted
    conv = conv + bconv_ref[...]
    u = _silu(conv)                                                    # (L, d_inner)

    # ---- x_proj (dt / B / C) and dt_proj + softplus ----
    dt_in = jnp.dot(u, wxdt_ref[...], preferred_element_type=jnp.float32)  # (L, dt_rank)
    Bmat = jnp.dot(u, wxb_ref[...], preferred_element_type=jnp.float32)    # (L, d_state)
    Cmat = jnp.dot(u, wxc_ref[...], preferred_element_type=jnp.float32)    # (L, d_state)
    delta = _softplus(
        jnp.dot(dt_in, wdt_ref[...], preferred_element_type=jnp.float32)
        + bdt_ref[...])                                                # (L, d_inner)

    # ---- selective state-space scan, state h: (d_state, d_inner) = (16, 128) ----
    AT = -jnp.exp(alogT_ref[...])                                      # (d_state, d_inner)
    BT = Bmat.T                                                        # (d_state, L)
    du = delta * u                                                     # (L, d_inner)

    h = jnp.zeros((d_state, d_inner), jnp.float32)
    ys = []
    for t in range(L):                      # static, fully unrolled recurrence
        dA_t = jnp.exp(delta[t:t + 1, :] * AT)                         # (d_state, d_inner)
        h = dA_t * h + BT[:, t:t + 1] * du[t:t + 1, :]                 # rank-1 update
        ys.append(jnp.dot(Cmat[t:t + 1, :], h,
                          preferred_element_type=jnp.float32))         # (1, d_inner)
    y = jnp.concatenate(ys, axis=0)                                    # (L, d_inner)

    # ---- skip (D), SiLU gate, out_proj, residual ----
    y = y + u * dpar_ref[...]
    y = y * _silu(z)
    out = jnp.dot(y, wout_ref[...], preferred_element_type=jnp.float32)  # (L, D)
    out_ref[0] = (x + out).astype(out_ref.dtype)


# --------------------------------------------------------------------------
# Wrapper
# --------------------------------------------------------------------------
def mamba_module_forward(x, p):
    """x: (B, L, d_model) -> (B, L, d_model). Equivalent of MambaModule.forward."""
    B, L, D = x.shape

    def full_spec(arr):
        nd = arr.ndim
        return pl.BlockSpec(arr.shape, lambda i, _nd=nd: (0,) * _nd)

    weights = [p['gamma'], p['win'], p['wconv'], p['bconv'],
               p['wxdt'], p['wxb'], p['wxc'], p['wdt'], p['bdt'],
               p['alogT'], p['dpar'], p['wout']]

    in_specs = [pl.BlockSpec((1, L, D), lambda i: (i, 0, 0))] + \
               [full_spec(w) for w in weights]
    out_specs = pl.BlockSpec((1, L, D), lambda i: (i, 0, 0))

    return pl.pallas_call(
        mamba_module_kernel,
        out_shape=jax.ShapeDtypeStruct((B, L, D), x.dtype),
        grid_spec=pltpu.PrefetchScalarGridSpec(
            num_scalar_prefetch=0,
            grid=(B,),                     # >= 2 blocks -> both v7x TensorCores get work
            in_specs=in_specs,
            out_specs=out_specs),
        compiler_params=pltpu.CompilerParams(
            dimension_semantics=("parallel",)),
    )(x, *weights)


# --------------------------------------------------------------------------
# Deterministic synthetic parameters (Mamba layout, weights pre-transposed)
# --------------------------------------------------------------------------
def init_mamba_params(key, d_model, d_state, d_conv, d_expand):
    d_inner = d_expand * d_model
    dt_rank = -(-d_model // 16)            # ceil(d_model / 16)
    ks = jax.random.split(key, 9)
    sc = 0.1

    def rnd(k, shape):
        return jax.random.normal(k, shape, jnp.float32) * sc

    # S4D-real init for A, stored transposed as A_log^T: (d_state, d_inner)
    alogT = (jnp.log(jnp.arange(1, d_state + 1, dtype=jnp.float32))[:, None]
             * jnp.ones((1, d_inner), jnp.float32))

    return {
        'gamma': jnp.ones((1, d_model), jnp.float32),          # RMSNorm gamma
        'win':   rnd(ks[0], (d_model, 2 * d_inner)),           # in_proj^T (no bias)
        'wconv': rnd(ks[1], (d_conv, d_inner)),                # depthwise conv taps
        'bconv': rnd(ks[2], (1, d_inner)),
        'wxdt':  rnd(ks[3], (d_inner, dt_rank)),               # x_proj^T split
        'wxb':   rnd(ks[4], (d_inner, d_state)),
        'wxc':   rnd(ks[5], (d_inner, d_state)),
        'wdt':   rnd(ks[6], (dt_rank, d_inner)),               # dt_proj^T
        'bdt':   rnd(ks[7], (1, d_inner)),                     # dt_proj bias
        'alogT': alogT,                                        # A = -exp(A_log)
        'dpar':  jnp.ones((1, d_inner), jnp.float32),          # skip D
        'wout':  rnd(ks[8], (d_inner, d_model)),               # out_proj^T (no bias)
    }


# --------------------------------------------------------------------------
# Pure-jnp reference for verification
# --------------------------------------------------------------------------
def mamba_module_reference(x, p):
    B, L, D = x.shape
    d_conv, d_inner = p['wconv'].shape
    d_state = p['alogT'].shape[0]

    nrm = jnp.sqrt(jnp.sum(x * x, axis=-1, keepdims=True))
    xn = x / jnp.maximum(nrm, 1e-12) * (float(D) ** 0.5) * p['gamma'][0]

    xz = xn @ p['win']
    xin, z = xz[..., :d_inner], xz[..., d_inner:]

    xpad = jnp.pad(xin, ((0, 0), (d_conv - 1, 0), (0, 0)))
    conv = sum(p['wconv'][k] * xpad[:, k:k + L, :] for k in range(d_conv)) + p['bconv'][0]
    u = conv * jax.nn.sigmoid(conv)

    dt_in = u @ p['wxdt']
    Bm = u @ p['wxb']
    Cm = u @ p['wxc']
    delta = jax.nn.softplus(dt_in @ p['wdt'] + p['bdt'][0])
    A = -jnp.exp(p['alogT'])                                   # (d_state, d_inner)

    h = jnp.zeros((B, d_state, d_inner), jnp.float32)
    ys = []
    for t in range(L):
        dA = jnp.exp(delta[:, t, None, :] * A[None])
        dBu = Bm[:, t, :, None] * (delta[:, t, :] * u[:, t, :])[:, None, :]
        h = dA * h + dBu
        ys.append(jnp.einsum('bs,bsi->bi', Cm[:, t, :], h))
    y = jnp.stack(ys, axis=1)
    y = y + u * p['dpar'][0]
    y = y * (z * jax.nn.sigmoid(z))
    return x + y @ p['wout']


if __name__ == "__main__":
    # batch=2, seq=16, d_model=64, d_state=16, d_conv=4, expand=2 -> d_inner=128
    B, L, d_model, d_state, d_conv, d_expand = 2, 16, 64, 16, 4, 2

    key = jax.random.PRNGKey(0)
    kx, kp = jax.random.split(key)
    x = jax.random.normal(kx, (B, L, d_model), jnp.float32)
    params = init_mamba_params(kp, d_model, d_state, d_conv, d_expand)

    out = mamba_module_forward(x, params)
    out = jax.block_until_ready(out)

    assert out.shape == (B, L, d_model), out.shape
    assert bool(jnp.all(jnp.isfinite(out)))

    ref = mamba_module_reference(x, params)
    max_err = float(jnp.max(jnp.abs(out - ref)))
    assert max_err < 2e-3, max_err

    print("KERNEL_OK")
</pallas_src>

<mosaic_0001>
module attributes {stable_mosaic.version = 11 : i64} {
  func.func @mamba_module_kernel(%arg0: i32, %arg1: memref<1x16x64xf32, #tpu.memory_space<vmem>>, %arg2: memref<1x64xf32, #tpu.memory_space<vmem>>, %arg3: memref<64x256xf32, #tpu.memory_space<vmem>>, %arg4: memref<4x128xf32, #tpu.memory_space<vmem>>, %arg5: memref<1x128xf32, #tpu.memory_space<vmem>>, %arg6: memref<128x4xf32, #tpu.memory_space<vmem>>, %arg7: memref<128x16xf32, #tpu.memory_space<vmem>>, %arg8: memref<128x16xf32, #tpu.memory_space<vmem>>, %arg9: memref<4x128xf32, #tpu.memory_space<vmem>>, %arg10: memref<1x128xf32, #tpu.memory_space<vmem>>, %arg11: memref<16x128xf32, #tpu.memory_space<vmem>>, %arg12: memref<1x128xf32, #tpu.memory_space<vmem>>, %arg13: memref<128x64xf32, #tpu.memory_space<vmem>>, %arg14: memref<1x16x64xf32, #tpu.memory_space<vmem>>) attributes {dimension_semantics = [#tpu.dimension_semantics<parallel>], iteration_bounds = array<i64: 2>, scalar_prefetch = 0 : i64, scratch_operands = 0 : i64, tpu.core_type = #tpu.core_type<tc>, window_params = [{transform_indices = @transform_0, window_bounds = array<i64: 1, 16, 64>}, {pipeline_mode = #tpu.pipeline_mode<synchronous>, transform_indices = @transform_1, window_bounds = array<i64: 1, 64>}, {pipeline_mode = #tpu.pipeline_mode<synchronous>, transform_indices = @transform_2, window_bounds = array<i64: 64, 256>}, {pipeline_mode = #tpu.pipeline_mode<synchronous>, transform_indices = @transform_3, window_bounds = array<i64: 4, 128>}, {pipeline_mode = #tpu.pipeline_mode<synchronous>, transform_indices = @transform_4, window_bounds = array<i64: 1, 128>}, {pipeline_mode = #tpu.pipeline_mode<synchronous>, transform_indices = @transform_5, window_bounds = array<i64: 128, 4>}, {pipeline_mode = #tpu.pipeline_mode<synchronous>, transform_indices = @transform_6, window_bounds = array<i64: 128, 16>}, {pipeline_mode = #tpu.pipeline_mode<synchronous>, transform_indices = @transform_7, window_bounds = array<i64: 128, 16>}, {pipeline_mode = #tpu.pipeline_mode<synchronous>, transform_indices = @transform_8, window_bounds = array<i64: 4, 128>}, {pipeline_mode = #tpu.pipeline_mode<synchronous>, transform_indices = @transform_9, window_bounds = array<i64: 1, 128>}, {pipeline_mode = #tpu.pipeline_mode<synchronous>, transform_indices = @transform_10, window_bounds = array<i64: 16, 128>}, {pipeline_mode = #tpu.pipeline_mode<synchronous>, transform_indices = @transform_11, window_bounds = array<i64: 1, 128>}, {pipeline_mode = #tpu.pipeline_mode<synchronous>, transform_indices = @transform_12, window_bounds = array<i64: 128, 64>}, {transform_indices = @transform_13, window_bounds = array<i64: 1, 16, 64>}]} {
    %c0 = arith.constant 0 : index
    %c0_0 = arith.constant 0 : index
    %c0_1 = arith.constant 0 : index
    %0 = vector.load %arg1[%c0, %c0_0, %c0_1] : memref<1x16x64xf32, #tpu.memory_space<vmem>>, vector<1x16x64xf32>
    %1 = vector.shape_cast %0 : vector<1x16x64xf32> to vector<16x64xf32>
    %2 = arith.mulf %1, %1 : vector<16x64xf32>
    %cst = arith.constant dense<0.000000e+00> : vector<16xf32>
    %3 = vector.multi_reduction <add>, %2, %cst [1] : vector<16x64xf32> to vector<16xf32>
    %4 = vector.shape_cast %3 : vector<16xf32> to vector<16x1xf32>
    %5 = math.sqrt %4 : vector<16x1xf32>
    %cst_2 = arith.constant 9.99999996E-13 : f32
    %6 = vector.broadcast %cst_2 : f32 to vector<16x1xf32>
    %7 = arith.maximumf %5, %6 : vector<16x1xf32>
    %cst_3 = arith.constant 8.000000e+00 : f32
    %8 = vector.broadcast %cst_3 : f32 to vector<16x1xf32>
    %9 = arith.divf %8, %7 : vector<16x1xf32>
    %10 = vector.broadcast %9 : vector<16x1xf32> to vector<16x64xf32>
    %11 = arith.mulf %1, %10 : vector<16x64xf32>
    %c0_4 = arith.constant 0 : index
    %c0_5 = arith.constant 0 : index
    %12 = vector.load %arg2[%c0_4, %c0_5] : memref<1x64xf32, #tpu.memory_space<vmem>>, vector<1x64xf32>
    %13 = vector.broadcast %12 : vector<1x64xf32> to vector<16x64xf32>
    %14 = arith.mulf %11, %13 : vector<16x64xf32>
    %c0_6 = arith.constant 0 : index
    %c0_7 = arith.constant 0 : index
    %15 = vector.load %arg3[%c0_6, %c0_7] : memref<64x256xf32, #tpu.memory_space<vmem>>, vector<64x256xf32>
    %cst_8 = arith.constant dense<0.000000e+00> : vector<16x256xf32>
    %16 = tpu.matmul %14, %15, %cst_8 {dimension_numbers = #tpu.dot_dimension_numbers<[1], [0], [0], [1], [0, 0, 1, 1], [], []>} : vector<16x64xf32>, vector<64x256xf32>, vector<16x256xf32> -> vector<16x256xf32>
    %17 = vector.extract_strided_slice %16 {offsets = [0, 0], sizes = [16, 128], strides = [1, 1]} : vector<16x256xf32> to vector<16x128xf32>
    %18 = vector.extract_strided_slice %16 {offsets = [0, 128], sizes = [16, 128], strides = [1, 1]} : vector<16x256xf32> to vector<16x128xf32>
    %cst_9 = arith.constant 0.000000e+00 : f32
    %19 = vector.broadcast %cst_9 : f32 to vector<16x128xf32>
    %cst_10 = arith.constant 0.000000e+00 : f32
    %20 = vector.broadcast %cst_10 : f32 to vector<3x128xf32>
    %21 = vector.extract_strided_slice %17 {offsets = [0, 0], sizes = [13, 128], strides = [1, 1]} : vector<16x128xf32> to vector<13x128xf32>
    %22 = tpu.concatenate %20, %21 in 0 : vector<3x128xf32>, vector<13x128xf32> -> vector<16x128xf32>
    %c0_11 = arith.constant 0 : index
    %c0_12 = arith.constant 0 : index
    %23 = vector.load %arg4[%c0_11, %c0_12] : memref<4x128xf32, #tpu.memory_space<vmem>>, vector<1x128xf32>
    %24 = vector.broadcast %23 : vector<1x128xf32> to vector<16x128xf32>
    %25 = arith.mulf %24, %22 : vector<16x128xf32>
    %26 = arith.addf %19, %25 : vector<16x128xf32>
    %cst_13 = arith.constant 0.000000e+00 : f32
    %27 = vector.broadcast %cst_13 : f32 to vector<2x128xf32>
    %28 = vector.extract_strided_slice %17 {offsets = [0, 0], sizes = [14, 128], strides = [1, 1]} : vector<16x128xf32> to vector<14x128xf32>
    %29 = tpu.concatenate %27, %28 in 0 : vector<2x128xf32>, vector<14x128xf32> -> vector<16x128xf32>
    %c1 = arith.constant 1 : index
    %c0_14 = arith.constant 0 : index
    %30 = vector.load %arg4[%c1, %c0_14] : memref<4x128xf32, #tpu.memory_space<vmem>>, vector<1x128xf32>
    %31 = vector.broadcast %30 : vector<1x128xf32> to vector<16x128xf32>
    %32 = arith.mulf %31, %29 : vector<16x128xf32>
    %33 = arith.addf %26, %32 : vector<16x128xf32>
    %cst_15 = arith.constant 0.000000e+00 : f32
    %34 = vector.broadcast %cst_15 : f32 to vector<1x128xf32>
    %35 = vector.extract_strided_slice %17 {offsets = [0, 0], sizes = [15, 128], strides = [1, 1]} : vector<16x128xf32> to vector<15x128xf32>
    %36 = tpu.concatenate %34, %35 in 0 : vector<1x128xf32>, vector<15x128xf32> -> vector<16x128xf32>
    %c2 = arith.constant 2 : index
    %c0_16 = arith.constant 0 : index
    %37 = vector.load %arg4[%c2, %c0_16] : memref<4x128xf32, #tpu.memory_space<vmem>>, vector<1x128xf32>
    %38 = vector.broadcast %37 : vector<1x128xf32> to vector<16x128xf32>
    %39 = arith.mulf %38, %36 : vector<16x128xf32>
    %40 = arith.addf %33, %39 : vector<16x128xf32>
    %c3 = arith.constant 3 : index
    %c0_17 = arith.constant 0 : index
    %41 = vector.load %arg4[%c3, %c0_17] : memref<4x128xf32, #tpu.memory_space<vmem>>, vector<1x128xf32>
    %42 = vector.broadcast %41 : vector<1x128xf32> to vector<16x128xf32>
    %43 = arith.mulf %42, %17 : vector<16x128xf32>
    %44 = arith.addf %40, %43 : vector<16x128xf32>
    %c0_18 = arith.constant 0 : index
    %c0_19 = arith.constant 0 : index
    %45 = vector.load %arg5[%c0_18, %c0_19] : memref<1x128xf32, #tpu.memory_space<vmem>>, vector<1x128xf32>
    %46 = vector.broadcast %45 : vector<1x128xf32> to vector<16x128xf32>
    %47 = arith.addf %44, %46 : vector<16x128xf32>
    %48 = arith.negf %47 : vector<16x128xf32>
    %49 = math.exp %48 : vector<16x128xf32>
    %cst_20 = arith.constant 1.000000e+00 : f32
    %50 = vector.broadcast %cst_20 : f32 to vector<16x128xf32>
    %51 = arith.addf %50, %49 : vector<16x128xf32>
    %52 = arith.divf %50, %51 : vector<16x128xf32>
    %53 = arith.mulf %47, %52 : vector<16x128xf32>
    %c0_21 = arith.constant 0 : index
    %c0_22 = arith.constant 0 : index
    %54 = vector.load %arg6[%c0_21, %c0_22] : memref<128x4xf32, #tpu.memory_space<vmem>>, vector<128x4xf32>
    %cst_23 = arith.constant dense<0.000000e+00> : vector<16x4xf32>
    %55 = tpu.matmul %53, %54, %cst_23 {dimension_numbers = #tpu.dot_dimension_numbers<[1], [0], [0], [1], [0, 0, 1, 1], [], []>} : vector<16x128xf32>, vector<128x4xf32>, vector<16x4xf32> -> vector<16x4xf32>
    %c0_24 = arith.constant 0 : index
    %c0_25 = arith.constant 0 : index
    %56 = vector.load %arg7[%c0_24, %c0_25] : memref<128x16xf32, #tpu.memory_space<vmem>>, vector<128x16xf32>
    %cst_26 = arith.constant dense<0.000000e+00> : vector<16x16xf32>
    %57 = tpu.matmul %53, %56, %cst_26 {dimension_numbers = #tpu.dot_dimension_numbers<[1], [0], [0], [1], [0, 0, 1, 1], [], []>} : vector<16x128xf32>, vector<128x16xf32>, vector<16x16xf32> -> vector<16x16xf32>
    %c0_27 = arith.constant 0 : index
    %c0_28 = arith.constant 0 : index
    %58 = vector.load %arg8[%c0_27, %c0_28] : memref<128x16xf32, #tpu.memory_space<vmem>>, vector<128x16xf32>
    %cst_29 = arith.constant dense<0.000000e+00> : vector<16x16xf32>
    %59 = tpu.matmul %53, %58, %cst_29 {dimension_numbers = #tpu.dot_dimension_numbers<[1], [0], [0], [1], [0, 0, 1, 1], [], []>} : vector<16x128xf32>, vector<128x16xf32>, vector<16x16xf32> -> vector<16x16xf32>
    %c0_30 = arith.constant 0 : index
    %c0_31 = arith.constant 0 : index
    %60 = vector.load %arg9[%c0_30, %c0_31] : memref<4x128xf32, #tpu.memory_space<vmem>>, vector<4x128xf32>
    %cst_32 = arith.constant dense<0.000000e+00> : vector<16x128xf32>
    %61 = tpu.matmul %55, %60, %cst_32 {dimension_numbers = #tpu.dot_dimension_numbers<[1], [0], [0], [1], [0, 0, 1, 1], [], []>} : vector<16x4xf32>, vector<4x128xf32>, vector<16x128xf32> -> vector<16x128xf32>
    %c0_33 = arith.constant 0 : index
    %c0_34 = arith.constant 0 : index
    %62 = vector.load %arg10[%c0_33, %c0_34] : memref<1x128xf32, #tpu.memory_space<vmem>>, vector<1x128xf32>
    %63 = vector.broadcast %62 : vector<1x128xf32> to vector<16x128xf32>
    %64 = arith.addf %61, %63 : vector<16x128xf32>
    %cst_35 = arith.constant 0.000000e+00 : f32
    %65 = vector.broadcast %cst_35 : f32 to vector<16x128xf32>
    %66 = arith.maximumf %64, %65 : vector<16x128xf32>
    %67 = math.absf %64 : vector<16x128xf32>
    %cst_36 = arith.constant 0.000000e+00 : f32
    %68 = vector.broadcast %cst_36 : f32 to vector<16x128xf32>
    %69 = arith.subf %68, %67 : vector<16x128xf32>
    %70 = math.exp %69 : vector<16x128xf32>
    %cst_37 = arith.constant 1.000000e+00 : f32
    %71 = vector.broadcast %cst_37 : f32 to vector<16x128xf32>
    %72 = arith.addf %71, %70 : vector<16x128xf32>
    %73 = math.log %72 : vector<16x128xf32>
    %74 = arith.addf %66, %73 : vector<16x128xf32>
    %c0_38 = arith.constant 0 : index
    %c0_39 = arith.constant 0 : index
    %75 = vector.load %arg11[%c0_38, %c0_39] : memref<16x128xf32, #tpu.memory_space<vmem>>, vector<16x128xf32>
    %76 = math.exp %75 : vector<16x128xf32>
    %cst_40 = arith.constant 0.000000e+00 : f32
    %77 = vector.broadcast %cst_40 : f32 to vector<16x128xf32>
    %78 = arith.subf %77, %76 : vector<16x128xf32>
    %79 = tpu.transpose %57, [1, 0] : vector<16x16xf32> -> vector<16x16xf32>
    %80 = arith.mulf %74, %53 : vector<16x128xf32>
    %cst_41 = arith.constant 0.000000e+00 : f32
    %81 = vector.broadcast %cst_41 : f32 to vector<16x128xf32>
    %82 = vector.extract_strided_slice %74 {offsets = [0, 0], sizes = [1, 128], strides = [1, 1]} : vector<16x128xf32> to vector<1x128xf32>
    %83 = vector.broadcast %82 : vector<1x128xf32> to vector<16x128xf32>
    %84 = arith.mulf %83, %78 : vector<16x128xf32>
    %85 = math.exp %84 : vector<16x128xf32>
    %86 = arith.mulf %85, %81 : vector<16x128xf32>
    %87 = vector.extract_strided_slice %79 {offsets = [0, 0], sizes = [16, 1], strides = [1, 1]} : vector<16x16xf32> to vector<16x1xf32>
    %88 = vector.extract_strided_slice %80 {offsets = [0, 0], sizes = [1, 128], strides = [1, 1]} : vector<16x128xf32> to vector<1x128xf32>
    %89 = vector.broadcast %87 : vector<16x1xf32> to vector<16x128xf32>
    %90 = vector.broadcast %88 : vector<1x128xf32> to vector<16x128xf32>
    %91 = arith.mulf %89, %90 : vector<16x128xf32>
    %92 = arith.addf %86, %91 : vector<16x128xf32>
    %93 = vector.extract_strided_slice %59 {offsets = [0, 0], sizes = [1, 16], strides = [1, 1]} : vector<16x16xf32> to vector<1x16xf32>
    %cst_42 = arith.constant dense<0.000000e+00> : vector<1x128xf32>
    %94 = tpu.matmul %93, %92, %cst_42 {dimension_numbers = #tpu.dot_dimension_numbers<[1], [0], [0], [1], [0, 0, 1, 1], [], []>} : vector<1x16xf32>, vector<16x128xf32>, vector<1x128xf32> -> vector<1x128xf32>
    %95 = vector.extract_strided_slice %74 {offsets = [1, 0], sizes = [1, 128], strides = [1, 1]} : vector<16x128xf32> to vector<1x128xf32>
    %96 = vector.broadcast %95 : vector<1x128xf32> to vector<16x128xf32>
    %97 = arith.mulf %96, %78 : vector<16x128xf32>
    %98 = math.exp %97 : vector<16x128xf32>
    %99 = arith.mulf %98, %92 : vector<16x128xf32>
    %100 = vector.extract_strided_slice %79 {offsets = [0, 1], sizes = [16, 1], strides = [1, 1]} : vector<16x16xf32> to vector<16x1xf32>
    %101 = vector.extract_strided_slice %80 {offsets = [1, 0], sizes = [1, 128], strides = [1, 1]} : vector<16x128xf32> to vector<1x128xf32>
    %102 = vector.broadcast %100 : vector<16x1xf32> to vector<16x128xf32>
    %103 = vector.broadcast %101 : vector<1x128xf32> to vector<16x128xf32>
    %104 = arith.mulf %102, %103 : vector<16x128xf32>
    %105 = arith.addf %99, %104 : vector<16x128xf32>
    %106 = vector.extract_strided_slice %59 {offsets = [1, 0], sizes = [1, 16], strides = [1, 1]} : vector<16x16xf32> to vector<1x16xf32>
    %cst_43 = arith.constant dense<0.000000e+00> : vector<1x128xf32>
    %107 = tpu.matmul %106, %105, %cst_43 {dimension_numbers = #tpu.dot_dimension_numbers<[1], [0], [0], [1], [0, 0, 1, 1], [], []>} : vector<1x16xf32>, vector<16x128xf32>, vector<1x128xf32> -> vector<1x128xf32>
    %108 = vector.extract_strided_slice %74 {offsets = [2, 0], sizes = [1, 128], strides = [1, 1]} : vector<16x128xf32> to vector<1x128xf32>
    %109 = vector.broadcast %108 : vector<1x128xf32> to vector<16x128xf32>
    %110 = arith.mulf %109, %78 : vector<16x128xf32>
    %111 = math.exp %110 : vector<16x128xf32>
    %112 = arith.mulf %111, %105 : vector<16x128xf32>
    %113 = vector.extract_strided_slice %79 {offsets = [0, 2], sizes = [16, 1], strides = [1, 1]} : vector<16x16xf32> to vector<16x1xf32>
    %114 = vector.extract_strided_slice %80 {offsets = [2, 0], sizes = [1, 128], strides = [1, 1]} : vector<16x128xf32> to vector<1x128xf32>
    %115 = vector.broadcast %113 : vector<16x1xf32> to vector<16x128xf32>
    %116 = vector.broadcast %114 : vector<1x128xf32> to vector<16x128xf32>
    %117 = arith.mulf %115, %116 : vector<16x128xf32>
    %118 = arith.addf %112, %117 : vector<16x128xf32>
    %119 = vector.extract_strided_slice %59 {offsets = [2, 0], sizes = [1, 16], strides = [1, 1]} : vector<16x16xf32> to vector<1x16xf32>
    %cst_44 = arith.constant dense<0.000000e+00> : vector<1x128xf32>
    %120 = tpu.matmul %119, %118, %cst_44 {dimension_numbers = #tpu.dot_dimension_numbers<[1], [0], [0], [1], [0, 0, 1, 1], [], []>} : vector<1x16xf32>, vector<16x128xf32>, vector<1x128xf32> -> vector<1x128xf32>
    %121 = vector.extract_strided_slice %74 {offsets = [3, 0], sizes = [1, 128], strides = [1, 1]} : vector<16x128xf32> to vector<1x128xf32>
    %122 = vector.broadcast %121 : vector<1x128xf32> to vector<16x128xf32>
    %123 = arith.mulf %122, %78 : vector<16x128xf32>
    %124 = math.exp %123 : vector<16x128xf32>
    %125 = arith.mulf %124, %118 : vector<16x128xf32>
    %126 = vector.extract_strided_slice %79 {offsets = [0, 3], sizes = [16, 1], strides = [1, 1]} : vector<16x16xf32> to vector<16x1xf32>
    %127 = vector.extract_strided_slice %80 {offsets = [3, 0], sizes = [1, 128], strides = [1, 1]} : vector<16x128xf32> to vector<1x128xf32>
    %128 = vector.broadcast %126 : vector<16x1xf32> to vector<16x128xf32>
    %129 = vector.broadcast %127 : vector<1x128xf32> to vector<16x128xf32>
    %130 = arith.mulf %128, %129 : vector<16x128xf32>
    %131 = arith.addf %125, %130 : vector<16x128xf32>
    %132 = vector.extract_strided_slice %59 {offsets = [3, 0], sizes = [1, 16], strides = [1, 1]} : vector<16x16xf32> to vector<1x16xf32>
    %cst_45 = arith.constant dense<0.000000e+00> : vector<1x128xf32>
    %133 = tpu.matmul %132, %131, %cst_45 {dimension_numbers = #tpu.dot_dimension_numbers<[1], [0], [0], [1], [0, 0, 1, 1], [], []>} : vector<1x16xf32>, vector<16x128xf32>, vector<1x128xf32> -> vector<1x128xf32>
    %134 = vector.extract_strided_slice %74 {offsets = [4, 0], sizes = [1, 128], strides = [1, 1]} : vector<16x128xf32> to vector<1x128xf32>
    %135 = vector.broadcast %134 : vector<1x128xf32> to vector<16x128xf32>
    %136 = arith.mulf %135, %78 : vector<16x128xf32>
    %137 = math.exp %136 : vector<16x128xf32>
    %138 = arith.mulf %137, %131 : vector<16x128xf32>
    %139 = vector.extract_strided_slice %79 {offsets = [0, 4], sizes = [16, 1], strides = [1, 1]} : vector<16x16xf32> to vector<16x1xf32>
    %140 = vector.extract_strided_slice %80 {offsets = [4, 0], sizes = [1, 128], strides = [1, 1]} : vector<16x128xf32> to vector<1x128xf32>
    %141 = vector.broadcast %139 : vector<16x1xf32> to vector<16x128xf32>
    %142 = vector.broadcast %140 : vector<1x128xf32> to vector<16x128xf32>
    %143 = arith.mulf %141, %142 : vector<16x128xf32>
    %144 = arith.addf %138, %143 : vector<16x128xf32>
    %145 = vector.extract_strided_slice %59 {offsets = [4, 0], sizes = [1, 16], strides = [1, 1]} : vector<16x16xf32> to vector<1x16xf32>
    %cst_46 = arith.constant dense<0.000000e+00> : vector<1x128xf32>
    %146 = tpu.matmul %145, %144, %cst_46 {dimension_numbers = #tpu.dot_dimension_numbers<[1], [0], [0], [1], [0, 0, 1, 1], [], []>} : vector<1x16xf32>, vector<16x128xf32>, vector<1x128xf32> -> vector<1x128xf32>
    %147 = vector.extract_strided_slice %74 {offsets = [5, 0], sizes = [1, 128], strides = [1, 1]} : vector<16x128xf32> to vector<1x128xf32>
    %148 = vector.broadcast %147 : vector<1x128xf32> to vector<16x128xf32>
    %149 = arith.mulf %148, %78 : vector<16x128xf32>
    %150 = math.exp %149 : vector<16x128xf32>
    %151 = arith.mulf %150, %144 : vector<16x128xf32>
    %152 = vector.extract_strided_slice %79 {offsets = [0, 5], sizes = [16, 1], strides = [1, 1]} : vector<16x16xf32> to vector<16x1xf32>
    %153 = vector.extract_strided_slice %80 {offsets = [5, 0], sizes = [1, 128], strides = [1, 1]} : vector<16x128xf32> to vector<1x128xf32>
    %154 = vector.broadcast %152 : vector<16x1xf32> to vector<16x128xf32>
    %155 = vector.broadcast %153 : vector<1x128xf32> to vector<16x128xf32>
    %156 = arith.mulf %154, %155 : vector<16x128xf32>
    %157 = arith.addf %151, %156 : vector<16x128xf32>
    %158 = vector.extract_strided_slice %59 {offsets = [5, 0], sizes = [1, 16], strides = [1, 1]} : vector<16x16xf32> to vector<1x16xf32>
    %cst_47 = arith.constant dense<0.000000e+00> : vector<1x128xf32>
    %159 = tpu.matmul %158, %157, %cst_47 {dimension_numbers = #tpu.dot_dimension_numbers<[1], [0], [0], [1], [0, 0, 1, 1], [], []>} : vector<1x16xf32>, vector<16x128xf32>, vector<1x128xf32> -> vector<1x128xf32>
    %160 = vector.extract_strided_slice %74 {offsets = [6, 0], sizes = [1, 128], strides = [1, 1]} : vector<16x128xf32> to vector<1x128xf32>
    %161 = vector.broadcast %160 : vector<1x128xf32> to vector<16x128xf32>
    %162 = arith.mulf %161, %78 : vector<16x128xf32>
    %163 = math.exp %162 : vector<16x128xf32>
    %164 = arith.mulf %163, %157 : vector<16x128xf32>
    %165 = vector.extract_strided_slice %79 {offsets = [0, 6], sizes = [16, 1], strides = [1, 1]} : vector<16x16xf32> to vector<16x1xf32>
    %166 = vector.extract_strided_slice %80 {offsets = [6, 0], sizes = [1, 128], strides = [1, 1]} : vector<16x128xf32> to vector<1x128xf32>
    %167 = vector.broadcast %165 : vector<16x1xf32> to vector<16x128xf32>
    %168 = vector.broadcast %166 : vector<1x128xf32> to vector<16x128xf32>
    %169 = arith.mulf %167, %168 : vector<16x128xf32>
    %170 = arith.addf %164, %169 : vector<16x128xf32>
    %171 = vector.extract_strided_slice %59 {offsets = [6, 0], sizes = [1, 16], strides = [1, 1]} : vector<16x16xf32> to vector<1x16xf32>
    %cst_48 = arith.constant dense<0.000000e+00> : vector<1x128xf32>
    %172 = tpu.matmul %171, %170, %cst_48 {dimension_numbers = #tpu.dot_dimension_numbers<[1], [0], [0], [1], [0, 0, 1, 1], [], []>} : vector<1x16xf32>, vector<16x128xf32>, vector<1x128xf32> -> vector<1x128xf32>
    %173 = vector.extract_strided_slice %74 {offsets = [7, 0], sizes = [1, 128], strides = [1, 1]} : vector<16x128xf32> to vector<1x128xf32>
    %174 = vector.broadcast %173 : vector<1x128xf32> to vector<16x128xf32>
    %175 = arith.mulf %174, %78 : vector<16x128xf32>
    %176 = math.exp %175 : vector<16x128xf32>
    %177 = arith.mulf %176, %170 : vector<16x128xf32>
    %178 = vector.extract_strided_slice %79 {offsets = [0, 7], sizes = [16, 1], strides = [1, 1]} : vector<16x16xf32> to vector<16x1xf32>
    %179 = vector.extract_strided_slice %80 {offsets = [7, 0], sizes = [1, 128], strides = [1, 1]} : vector<16x128xf32> to vector<1x128xf32>
    %180 = vector.broadcast %178 : vector<16x1xf32> to vector<16x128xf32>
    %181 = vector.broadcast %179 : vector<1x128xf32> to vector<16x128xf32>
    %182 = arith.mulf %180, %181 : vector<16x128xf32>
    %183 = arith.addf %177, %182 : vector<16x128xf32>
    %184 = vector.extract_strided_slice %59 {offsets = [7, 0], sizes = [1, 16], strides = [1, 1]} : vector<16x16xf32> to vector<1x16xf32>
    %cst_49 = arith.constant dense<0.000000e+00> : vector<1x128xf32>
    %185 = tpu.matmul %184, %183, %cst_49 {dimension_numbers = #tpu.dot_dimension_numbers<[1], [0], [0], [1], [0, 0, 1, 1], [], []>} : vector<1x16xf32>, vector<16x128xf32>, vector<1x128xf32> -> vector<1x128xf32>
    %186 = vector.extract_strided_slice %74 {offsets = [8, 0], sizes = [1, 128], strides = [1, 1]} : vector<16x128xf32> to vector<1x128xf32>
    %187 = vector.broadcast %186 : vector<1x128xf32> to vector<16x128xf32>
    %188 = arith.mulf %187, %78 : vector<16x128xf32>
    %189 = math.exp %188 : vector<16x128xf32>
    %190 = arith.mulf %189, %183 : vector<16x128xf32>
    %191 = vector.extract_strided_slice %79 {offsets = [0, 8], sizes = [16, 1], strides = [1, 1]} : vector<16x16xf32> to vector<16x1xf32>
    %192 = vector.extract_strided_slice %80 {offsets = [8, 0], sizes = [1, 128], strides = [1, 1]} : vector<16x128xf32> to vector<1x128xf32>
    %193 = vector.broadcast %191 : vector<16x1xf32> to vector<16x128xf32>
    %194 = vector.broadcast %192 : vector<1x128xf32> to vector<16x128xf32>
    %195 = arith.mulf %193, %194 : vector<16x128xf32>
    %196 = arith.addf %190, %195 : vector<16x128xf32>
    %197 = vector.extract_strided_slice %59 {offsets = [8, 0], sizes = [1, 16], strides = [1, 1]} : vector<16x16xf32> to vector<1x16xf32>
    %cst_50 = arith.constant dense<0.000000e+00> : vector<1x128xf32>
    %198 = tpu.matmul %197, %196, %cst_50 {dimension_numbers = #tpu.dot_dimension_numbers<[1], [0], [0], [1], [0, 0, 1, 1], [], []>} : vector<1x16xf32>, vector<16x128xf32>, vector<1x128xf32> -> vector<1x128xf32>
    %199 = vector.extract_strided_slice %74 {offsets = [9, 0], sizes = [1, 128], strides = [1, 1]} : vector<16x128xf32> to vector<1x128xf32>
    %200 = vector.broadcast %199 : vector<1x128xf32> to vector<16x128xf32>
    %201 = arith.mulf %200, %78 : vector<16x128xf32>
    %202 = math.exp %201 : vector<16x128xf32>
    %203 = arith.mulf %202, %196 : vector<16x128xf32>
    %204 = vector.extract_strided_slice %79 {offsets = [0, 9], sizes = [16, 1], strides = [1, 1]} : vector<16x16xf32> to vector<16x1xf32>
    %205 = vector.extract_strided_slice %80 {offsets = [9, 0], sizes = [1, 128], strides = [1, 1]} : vector<16x128xf32> to vector<1x128xf32>
    %206 = vector.broadcast %204 : vector<16x1xf32> to vector<16x128xf32>
    %207 = vector.broadcast %205 : vector<1x128xf32> to vector<16x128xf32>
    %208 = arith.mulf %206, %207 : vector<16x128xf32>
    %209 = arith.addf %203, %208 : vector<16x128xf32>
    %210 = vector.extract_strided_slice %59 {offsets = [9, 0], sizes = [1, 16], strides = [1, 1]} : vector<16x16xf32> to vector<1x16xf32>
    %cst_51 = arith.constant dense<0.000000e+00> : vector<1x128xf32>
    %211 = tpu.matmul %210, %209, %cst_51 {dimension_numbers = #tpu.dot_dimension_numbers<[1], [0], [0], [1], [0, 0, 1, 1], [], []>} : vector<1x16xf32>, vector<16x128xf32>, vector<1x128xf32> -> vector<1x128xf32>
    %212 = vector.extract_strided_slice %74 {offsets = [10, 0], sizes = [1, 128], strides = [1, 1]} : vector<16x128xf32> to vector<1x128xf32>
    %213 = vector.broadcast %212 : vector<1x128xf32> to vector<16x128xf32>
    %214 = arith.mulf %213, %78 : vector<16x128xf32>
    %215 = math.exp %214 : vector<16x128xf32>
    %216 = arith.mulf %215, %209 : vector<16x128xf32>
    %217 = vector.extract_strided_slice %79 {offsets = [0, 10], sizes = [16, 1], strides = [1, 1]} : vector<16x16xf32> to vector<16x1xf32>
    %218 = vector.extract_strided_slice %80 {offsets = [10, 0], sizes = [1, 128], strides = [1, 1]} : vector<16x128xf32> to vector<1x128xf32>
    %219 = vector.broadcast %217 : vector<16x1xf32> to vector<16x128xf32>
    %220 = vector.broadcast %218 : vector<1x128xf32> to vector<16x128xf32>
    %221 = arith.mulf %219, %220 : vector<16x128xf32>
    %222 = arith.addf %216, %221 : vector<16x128xf32>
    %223 = vector.extract_strided_slice %59 {offsets = [10, 0], sizes = [1, 16], strides = [1, 1]} : vector<16x16xf32> to vector<1x16xf32>
    %cst_52 = arith.constant dense<0.000000e+00> : vector<1x128xf32>
    %224 = tpu.matmul %223, %222, %cst_52 {dimension_numbers = #tpu.dot_dimension_numbers<[1], [0], [0], [1], [0, 0, 1, 1], [], []>} : vector<1x16xf32>, vector<16x128xf32>, vector<1x128xf32> -> vector<1x128xf32>
    %225 = vector.extract_strided_slice %74 {offsets = [11, 0], sizes = [1, 128], strides = [1, 1]} : vector<16x128xf32> to vector<1x128xf32>
    %226 = vector.broadcast %225 : vector<1x128xf32> to vector<16x128xf32>
    %227 = arith.mulf %226, %78 : vector<16x128xf32>
    %228 = math.exp %227 : vector<16x128xf32>
    %229 = arith.mulf %228, %222 : vector<16x128xf32>
    %230 = vector.extract_strided_slice %79 {offsets = [0, 11], sizes = [16, 1], strides = [1, 1]} : vector<16x16xf32> to vector<16x1xf32>
    %231 = vector.extract_strided_slice %80 {offsets = [11, 0], sizes = [1, 128], strides = [1, 1]} : vector<16x128xf32> to vector<1x128xf32>
    %232 = vector.broadcast %230 : vector<16x1xf32> to vector<16x128xf32>
    %233 = vector.broadcast %231 : vector<1x128xf32> to vector<16x128xf32>
    %234 = arith.mulf %232, %233 : vector<16x128xf32>
    %235 = arith.addf %229, %234 : vector<16x128xf32>
    %236 = vector.extract_strided_slice %59 {offsets = [11, 0], sizes = [1, 16], strides = [1, 1]} : vector<16x16xf32> to vector<1x16xf32>
    %cst_53 = arith.constant dense<0.000000e+00> : vector<1x128xf32>
    %237 = tpu.matmul %236, %235, %cst_53 {dimension_numbers = #tpu.dot_dimension_numbers<[1], [0], [0], [1], [0, 0, 1, 1], [], []>} : vector<1x16xf32>, vector<16x128xf32>, vector<1x128xf32> -> vector<1x128xf32>
    %238 = vector.extract_strided_slice %74 {offsets = [12, 0], sizes = [1, 128], strides = [1, 1]} : vector<16x128xf32> to vector<1x128xf32>
    %239 = vector.broadcast %238 : vector<1x128xf32> to vector<16x128xf32>
    %240 = arith.mulf %239, %78 : vector<16x128xf32>
    %241 = math.exp %240 : vector<16x128xf32>
    %242 = arith.mulf %241, %235 : vector<16x128xf32>
    %243 = vector.extract_strided_slice %79 {offsets = [0, 12], sizes = [16, 1], strides = [1, 1]} : vector<16x16xf32> to vector<16x1xf32>
    %244 = vector.extract_strided_slice %80 {offsets = [12, 0], sizes = [1, 128], strides = [1, 1]} : vector<16x128xf32> to vector<1x128xf32>
    %245 = vector.broadcast %243 : vector<16x1xf32> to vector<16x128xf32>
    %246 = vector.broadcast %244 : vector<1x128xf32> to vector<16x128xf32>
    %247 = arith.mulf %245, %246 : vector<16x128xf32>
    %248 = arith.addf %242, %247 : vector<16x128xf32>
    %249 = vector.extract_strided_slice %59 {offsets = [12, 0], sizes = [1, 16], strides = [1, 1]} : vector<16x16xf32> to vector<1x16xf32>
    %cst_54 = arith.constant dense<0.000000e+00> : vector<1x128xf32>
    %250 = tpu.matmul %249, %248, %cst_54 {dimension_numbers = #tpu.dot_dimension_numbers<[1], [0], [0], [1], [0, 0, 1, 1], [], []>} : vector<1x16xf32>, vector<16x128xf32>, vector<1x128xf32> -> vector<1x128xf32>
    %251 = vector.extract_strided_slice %74 {offsets = [13, 0], sizes = [1, 128], strides = [1, 1]} : vector<16x128xf32> to vector<1x128xf32>
    %252 = vector.broadcast %251 : vector<1x128xf32> to vector<16x128xf32>
    %253 = arith.mulf %252, %78 : vector<16x128xf32>
    %254 = math.exp %253 : vector<16x128xf32>
    %255 = arith.mulf %254, %248 : vector<16x128xf32>
    %256 = vector.extract_strided_slice %79 {offsets = [0, 13], sizes = [16, 1], strides = [1, 1]} : vector<16x16xf32> to vector<16x1xf32>
    %257 = vector.extract_strided_slice %80 {offsets = [13, 0], sizes = [1, 128], strides = [1, 1]} : vector<16x128xf32> to vector<1x128xf32>
    %258 = vector.broadcast %256 : vector<16x1xf32> to vector<16x128xf32>
    %259 = vector.broadcast %257 : vector<1x128xf32> to vector<16x128xf32>
    %260 = arith.mulf %258, %259 : vector<16x128xf32>
    %261 = arith.addf %255, %260 : vector<16x128xf32>
    %262 = vector.extract_strided_slice %59 {offsets = [13, 0], sizes = [1, 16], strides = [1, 1]} : vector<16x16xf32> to vector<1x16xf32>
    %cst_55 = arith.constant dense<0.000000e+00> : vector<1x128xf32>
    %263 = tpu.matmul %262, %261, %cst_55 {dimension_numbers = #tpu.dot_dimension_numbers<[1], [0], [0], [1], [0, 0, 1, 1], [], []>} : vector<1x16xf32>, vector<16x128xf32>, vector<1x128xf32> -> vector<1x128xf32>
    %264 = vector.extract_strided_slice %74 {offsets = [14, 0], sizes = [1, 128], strides = [1, 1]} : vector<16x128xf32> to vector<1x128xf32>
    %265 = vector.broadcast %264 : vector<1x128xf32> to vector<16x128xf32>
    %266 = arith.mulf %265, %78 : vector<16x128xf32>
    %267 = math.exp %266 : vector<16x128xf32>
    %268 = arith.mulf %267, %261 : vector<16x128xf32>
    %269 = vector.extract_strided_slice %79 {offsets = [0, 14], sizes = [16, 1], strides = [1, 1]} : vector<16x16xf32> to vector<16x1xf32>
    %270 = vector.extract_strided_slice %80 {offsets = [14, 0], sizes = [1, 128], strides = [1, 1]} : vector<16x128xf32> to vector<1x128xf32>
    %271 = vector.broadcast %269 : vector<16x1xf32> to vector<16x128xf32>
    %272 = vector.broadcast %270 : vector<1x128xf32> to vector<16x128xf32>
    %273 = arith.mulf %271, %272 : vector<16x128xf32>
    %274 = arith.addf %268, %273 : vector<16x128xf32>
    %275 = vector.extract_strided_slice %59 {offsets = [14, 0], sizes = [1, 16], strides = [1, 1]} : vector<16x16xf32> to vector<1x16xf32>
    %cst_56 = arith.constant dense<0.000000e+00> : vector<1x128xf32>
    %276 = tpu.matmul %275, %274, %cst_56 {dimension_numbers = #tpu.dot_dimension_numbers<[1], [0], [0], [1], [0, 0, 1, 1], [], []>} : vector<1x16xf32>, vector<16x128xf32>, vector<1x128xf32> -> vector<1x128xf32>
    %277 = vector.extract_strided_slice %74 {offsets = [15, 0], sizes = [1, 128], strides = [1, 1]} : vector<16x128xf32> to vector<1x128xf32>
    %278 = vector.broadcast %277 : vector<1x128xf32> to vector<16x128xf32>
    %279 = arith.mulf %278, %78 : vector<16x128xf32>
    %280 = math.exp %279 : vector<16x128xf32>
    %281 = arith.mulf %280, %274 : vector<16x128xf32>
    %282 = vector.extract_strided_slice %79 {offsets = [0, 15], sizes = [16, 1], strides = [1, 1]} : vector<16x16xf32> to vector<16x1xf32>
    %283 = vector.extract_strided_slice %80 {offsets = [15, 0], sizes = [1, 128], strides = [1, 1]} : vector<16x128xf32> to vector<1x128xf32>
    %284 = vector.broadcast %282 : vector<16x1xf32> to vector<16x128xf32>
    %285 = vector.broadcast %283 : vector<1x128xf32> to vector<16x128xf32>
    %286 = arith.mulf %284, %285 : vector<16x128xf32>
    %287 = arith.addf %281, %286 : vector<16x128xf32>
    %288 = vector.extract_strided_slice %59 {offsets = [15, 0], sizes = [1, 16], strides = [1, 1]} : vector<16x16xf32> to vector<1x16xf32>
    %cst_57 = arith.constant dense<0.000000e+00> : vector<1x128xf32>
    %289 = tpu.matmul %288, %287, %cst_57 {dimension_numbers = #tpu.dot_dimension_numbers<[1], [0], [0], [1], [0, 0, 1, 1], [], []>} : vector<1x16xf32>, vector<16x128xf32>, vector<1x128xf32> -> vector<1x128xf32>
    %290 = tpu.concatenate %94, %107, %120, %133, %146, %159, %172, %185, %198, %211, %224, %237, %250, %263, %276, %289 in 0 : vector<1x128xf32>, vector<1x128xf32>, vector<1x128xf32>, vector<1x128xf32>, vector<1x128xf32>, vector<1x128xf32>, vector<1x128xf32>, vector<1x128xf32>, vector<1x128xf32>, vector<1x128xf32>, vector<1x128xf32>, vector<1x128xf32>, vector<1x128xf32>, vector<1x128xf32>, vector<1x128xf32>, vector<1x128xf32> -> vector<16x128xf32>
    %c0_58 = arith.constant 0 : index
    %c0_59 = arith.constant 0 : index
    %291 = vector.load %arg12[%c0_58, %c0_59] : memref<1x128xf32, #tpu.memory_space<vmem>>, vector<1x128xf32>
    %292 = vector.broadcast %291 : vector<1x128xf32> to vector<16x128xf32>
    %293 = arith.mulf %53, %292 : vector<16x128xf32>
    %294 = arith.addf %290, %293 : vector<16x128xf32>
    %295 = arith.negf %18 : vector<16x128xf32>
    %296 = math.exp %295 : vector<16x128xf32>
    %cst_60 = arith.constant 1.000000e+00 : f32
    %297 = vector.broadcast %cst_60 : f32 to vector<16x128xf32>
    %298 = arith.addf %297, %296 : vector<16x128xf32>
    %299 = arith.divf %297, %298 : vector<16x128xf32>
    %300 = arith.mulf %18, %299 : vector<16x128xf32>
    %301 = arith.mulf %294, %300 : vector<16x128xf32>
    %c0_61 = arith.constant 0 : index
    %c0_62 = arith.constant 0 : index
    %302 = vector.load %arg13[%c0_61, %c0_62] : memref<128x64xf32, #tpu.memory_space<vmem>>, vector<128x64xf32>
    %cst_63 = arith.constant dense<0.000000e+00> : vector<16x64xf32>
    %303 = tpu.matmul %301, %302, %cst_63 {dimension_numbers = #tpu.dot_dimension_numbers<[1], [0], [0], [1], [0, 0, 1, 1], [], []>} : vector<16x128xf32>, vector<128x64xf32>, vector<16x64xf32> -> vector<16x64xf32>
    %304 = arith.addf %1, %303 : vector<16x64xf32>
    %c0_64 = arith.constant 0 : index
    %c0_65 = arith.constant 0 : index
    %c0_66 = arith.constant 0 : index
    %305 = vector.load %arg14[%c0_64, %c0_65, %c0_66] : memref<1x16x64xf32, #tpu.memory_space<vmem>>, vector<1x16x64xf32>
    %306 = vector.shape_cast %305 : vector<1x16x64xf32> to vector<16x64xf32>
    %307 = vector.shape_cast %304 : vector<16x64xf32> to vector<1x16x64xf32>
    tpu.vector_store %arg14[%c0_64, %c0_65, %c0_66], %307 {strides = array<i32>} : memref<1x16x64xf32, #tpu.memory_space<vmem>>, vector<1x16x64xf32>,
    return
  }
  func.func @transform_0(%arg0: i32) -> (i32, i32, i32) {
    %c0_i32 = arith.constant 0 : i32
    %c0_i32_0 = arith.constant 0 : i32
    %c0_i32_1 = arith.constant 0 : i32
    return %arg0, %c0_i32, %c0_i32_0 : i32, i32, i32
  }
  func.func @transform_1(%arg0: i32) -> (i32, i32) {
    %c0_i32 = arith.constant 0 : i32
    %c0_i32_0 = arith.constant 0 : i32
    %c0_i32_1 = arith.constant 0 : i32
    return %c0_i32, %c0_i32_0 : i32, i32
  }
  func.func @transform_2(%arg0: i32) -> (i32, i32) {
    %c0_i32 = arith.constant 0 : i32
    %c0_i32_0 = arith.constant 0 : i32
    %c0_i32_1 = arith.constant 0 : i32
    return %c0_i32, %c0_i32_0 : i32, i32
  }
  func.func @transform_3(%arg0: i32) -> (i32, i32) {
    %c0_i32 = arith.constant 0 : i32
    %c0_i32_0 = arith.constant 0 : i32
    %c0_i32_1 = arith.constant 0 : i32
    return %c0_i32, %c0_i32_0 : i32, i32
  }
  func.func @transform_4(%arg0: i32) -> (i32, i32) {
    %c0_i32 = arith.constant 0 : i32
    %c0_i32_0 = arith.constant 0 : i32
    %c0_i32_1 = arith.constant 0 : i32
    return %c0_i32, %c0_i32_0 : i32, i32
  }
  func.func @transform_5(%arg0: i32) -> (i32, i32) {
    %c0_i32 = arith.constant 0 : i32
    %c0_i32_0 = arith.constant 0 : i32
    %c0_i32_1 = arith.constant 0 : i32
    return %c0_i32, %c0_i32_0 : i32, i32
  }
  func.func @transform_6(%arg0: i32) -> (i32, i32) {
    %c0_i32 = arith.constant 0 : i32
    %c0_i32_0 = arith.constant 0 : i32
    %c0_i32_1 = arith.constant 0 : i32
    return %c0_i32, %c0_i32_0 : i32, i32
  }
  func.func @transform_7(%arg0: i32) -> (i32, i32) {
    %c0_i32 = arith.constant 0 : i32
    %c0_i32_0 = arith.constant 0 : i32
    %c0_i32_1 = arith.constant 0 : i32
    return %c0_i32, %c0_i32_0 : i32, i32
  }
  func.func @transform_8(%arg0: i32) -> (i32, i32) {
    %c0_i32 = arith.constant 0 : i32
    %c0_i32_0 = arith.constant 0 : i32
    %c0_i32_1 = arith.constant 0 : i32
    return %c0_i32, %c0_i32_0 : i32, i32
  }
  func.func @transform_9(%arg0: i32) -> (i32, i32) {
    %c0_i32 = arith.constant 0 : i32
    %c0_i32_0 = arith.constant 0 : i32
    %c0_i32_1 = arith.constant 0 : i32
    return %c0_i32, %c0_i32_0 : i32, i32
  }
  func.func @transform_10(%arg0: i32) -> (i32, i32) {
    %c0_i32 = arith.constant 0 : i32
    %c0_i32_0 = arith.constant 0 : i32
    %c0_i32_1 = arith.constant 0 : i32
    return %c0_i32, %c0_i32_0 : i32, i32
  }
  func.func @transform_11(%arg0: i32) -> (i32, i32) {
    %c0_i32 = arith.constant 0 : i32
    %c0_i32_0 = arith.constant 0 : i32
    %c0_i32_1 = arith.constant 0 : i32
    return %c0_i32, %c0_i32_0 : i32, i32
  }
  func.func @transform_12(%arg0: i32) -> (i32, i32) {
    %c0_i32 = arith.constant 0 : i32
    %c0_i32_0 = arith.constant 0 : i32
    %c0_i32_1 = arith.constant 0 : i32
    return %c0_i32, %c0_i32_0 : i32, i32
  }
  func.func @transform_13(%arg0: i32) -> (i32, i32, i32) {
    %c0_i32 = arith.constant 0 : i32
    %c0_i32_0 = arith.constant 0 : i32
    %c0_i32_1 = arith.constant 0 : i32
    return %arg0, %c0_i32, %c0_i32_0 : i32, i32, i32
  }
}

</mosaic_0001>

<bundles_post_ra>
// kernel: tpu_custom_call.1
= control target key start
LH: loop header
LB: loop body
LE: loop exit
PB: predicated region body
PF: predicated region fallthrough
CT: control target
= control target key end

     0   :  { %s3039_s0 = inlined_call_operand.vmem [shape: f32[2,16,64], index: 0, kind: input, shape index: {}]   ;;  %s3040_s1 = inlined_call_operand.vmem [shape: f32[1,64], index: 1, kind: input, shape index: {}]   ;;  %s3041_s2 = inlined_call_operand.vmem [shape: f32[64,256], index: 2, kind: input, shape index: {}]   ;;  %s3042_s3 = inlined_call_operand.vmem [shape: f32[4,128], index: 3, kind: input, shape index: {}]   ;;  %s3043_s4 = inlined_call_operand.vmem [shape: f32[1,128], index: 4, kind: input, shape index: {}]   ;;  %s3044_s5 = inlined_call_operand.vmem [shape: f32[128,4], index: 5, kind: input, shape index: {}]   ;;  %s3045_s6 = inlined_call_operand.vmem [shape: f32[128,16], index: 6, kind: input, shape index: {}]   ;;  %s3046_s7 = inlined_call_operand.vmem [shape: f32[128,16], index: 7, kind: input, shape index: {}]   ;;  %s3047_s8 = inlined_call_operand.vmem [shape: f32[4,128], index: 8, kind: input, shape index: {}]   ;;  %s3048_s9 = inlined_call_operand.vmem [shape: f32[1,128], index: 9, kind: input, shape index: {}]   ;;  %s3049_s10 = inlined_call_operand.vmem [shape: f32[16,128], index: 10, kind: input, shape index: {}]   ;;  %s3050_s11 = inlined_call_operand.vmem [shape: f32[1,128], index: 11, kind: input, shape index: {}]   ;;  %s3051_s12 = inlined_call_operand.vmem [shape: f32[128,64], index: 12, kind: input, shape index: {}]   ;;  %s3052_s13 = inlined_call_operand.hbm [shape: f32[2,16,64], index: 13, kind: output, shape index: {}]  }
   0x1   :  { %3058 = sst [smem:[#allocation7_spill]] %s3039_s0 }
   0x2   :  { %3059 = sst [smem:[#allocation8_spill]] %s3040_s1 }
   0x3   :  { %18 = vsyncpa [#allocation3], 0 }
   0x4   :  { %20 = vsyncpa [#allocation3 + $0x1], 0  ;;  %s2238_s25 = smov 0   ;;  %s2240_s26 = smov 0  }
   0x5   :  { %s2242_s27 = smov 0   ;;  %s2244_s28 = smov 0  }
   0x6 LB: > { %3060 = sst [smem:[#allocation5_spill]] %s2144_s27  ;;  %s2259_s29 = sadd.s32 4294967295, %s2148_s28   ;;  %s2148_s28 = sphi %s2244_s28, %s3076_s28   ;;  %s2144_s27 = sphi %s2242_s27, %s3073_s27   ;;  %s2140_s26 = sphi %s2240_s26, %s3075_s26   ;;  %s2136_s25 = sphi %s2238_s25, %s3074_s25  }
   0x7   : > { %s1844_s30 = sadd.s32 4294967294, %s2148_s28   ;;  %s2263_s14 = sadd.s32 1, %s2148_s28  }
   0x8   : > { %s311_s15 = sadd.s32 1, %s2144_s27  ;;  %s308_s16 = ssub.s32 %s2148_s28, %s2263_s14 }
   0x9   : > { %p321_p0 = scmp.ne.s32.totalorder %s2144_s27, %s2140_s26  ;;  %p309_p1 = scmp.eq.s32.totalorder %s308_s16, 0 }
   0xa   : > { %p322_p2 = scmp.eq.s32.totalorder %s2259_s29, 1  ;;  %p327_p3 = scmp.ne.s32.totalorder %s2140_s26, %s2136_s25 }
   0xb   : > { %p328_p4 = scmp.eq.s32.totalorder %s1844_s30, 1  ;;  %p1847_p7 = scmp.ge.s32.totalorder %s2148_s28, 1 }
   0xc   : > { %s2274_s17 = scalar_select %p309_p1, %s2144_s27, %s311_s15  }
   0xd   : > { %p2276_p5 = por %p322_p2, %p321_p0  ;;  %p2280_p6 = por %p328_p4, %p327_p3 }
   0xe   : > { %3061 = sst [smem:[#allocation6_spill]] %s2274_s17  ;;  %p390_p8 = scmp.lt.s32.totalorder %s2148_s28, 3 }
  0x10   : > { %p391_p9 = pnand %p1847_p7, %p390_p8 }
  0x11   : > { %p434_p10 = scmp.lt.s32.totalorder (!%p391_p9), %s2259_s29, 1  ;;  %s3064_s0 = sld [smem:[#allocation7_spill]] (!%p391_p9) }
  0x12   : > { %394 = sbr.rel (%p391_p9) target bundleno = 1206 (0x4b6), region = 72  ;;  %s3065_s1 = sld [smem:[#allocation8_spill]] (!%p391_p9) }
  0x13   : > { %s431_s16 = sand.u32 (!%p391_p9), 1, %s2140_s26   ;;  %s1884_s22 = sshll.u32 (!%p391_p9), %s2259_s29, 4 }
  0x14   : > { %s1778_s27 = scalar_lea.hbm (!%p391_p9), %s3052_s13, %s1884_s22  ;;  %s1767_s15 = scalar_lea.sflag (!%p391_p9), [#allocation3], %s431_s16 }
  0x15   : > { %s1781_s30 = sshll.u32 (!%p391_p9), %s1778_s27, 4  ;;  %s2106_s22 = scalar_lea.hbm (!%p391_p9), %s3052_s13, 32  ;;  %s1782_s30 = int_to_ptr.hbm [resolvable:$true] %s1781_s30 }
  0x17   : > { %s435_s20 = scalar_select %p434_p10, %s2259_s29, 1  ;;  %vm443_vm0 = vcmask 523264   ;;  %v528_v6 = vld [vmem:[%s3041_s2 + $0x70] sm:$0xff]  ;;  %v529_v7 = vld [vmem:[%s3041_s2 + $0x78] sm:$0xff]  ;;  %v526_v9 = vld [vmem:[%s3041_s2 + $0x60] sm:$0xff]  ;;  %vm584_vm13 = vcmask 1042432  }
  0x18   : > { %544 = vmatpush.msra.mxu0 %v528_v6  ;;  %567 = vmatpush.msra.mxu1 %v529_v7  ;;  %v527_v10 = vld [vmem:[%s3041_s2 + $0x68] sm:$0xff]  ;;  %v524_v11 = vld [vmem:[%s3041_s2 + $0x50] sm:$0xff]  ;;  %v525_v12 = vld [vmem:[%s3041_s2 + $0x58] sm:$0xff]  ;;  %vm597_vm14 = vcmask 1041408   ;;  %vm610_vm15 = vcmask 1040384  }
  0x19   : > { %s1883_s21 = sshll.u32 %s435_s20, 4  ;;  %v522_v13 = vld [vmem:[%s3041_s2 + $0x40] sm:$0xff]  ;;  %v523_v14 = vld [vmem:[%s3041_s2 + $0x48] sm:$0xff]  ;;  %v520_v15 = vld [vmem:[%s3041_s2 + $0x30] sm:$0xff]  ;;  %s1848_s20 = sshll.u32 %s431_s16, 4 }
  0x1a   : > { %s2291_s24 = scalar_lea.vmem %s3064_s0, %s1883_s21  ;;  %545 = vmatpush.msra.mxu0 %v526_v9  ;;  %568 = vmatpush.msra.mxu1 %v527_v10  ;;  %v521_v16 = vld [vmem:[%s3041_s2 + $0x38] sm:$0xff]  ;;  %v518_v18 = vld [vmem:[%s3041_s2 + $0x20] sm:$0xff]  ;;  %v519_v19 = vld [vmem:[%s3041_s2 + $0x28] sm:$0xff]  ;;  %s433_s21 = scalar_lea.vmem [#allocation2], %s1848_s20 }
  0x1b   : > { %v2294_v0 = vld [vmem:[%s2291_s24] sm:$0xff]  ;;  %v2299_v2 = vld [vmem:[%s2291_s24 + $0x8] sm:$0xff]  ;;  %v516_v22 = vld [vmem:[%s3041_s2 + $0x10] sm:$0xff]  ;;  %s1779_s17 = sshll.u32 %s433_s21, 4  ;;  %s1780_s17 = int_to_ptr.vmem [resolvable:$true] %s1779_s17 }
  0x1c   : > { %v441_v1 = vmul.f32 %v2294_v0, %v2294_v0  ;;  %v442_v4 = vmul.f32 %v2299_v2, %v2299_v2  ;;  %546 = vmatpush.msra.mxu0 %v524_v11  ;;  %569 = vmatpush.msra.mxu1 %v525_v12  ;;  %v517_v23 = vld [vmem:[%s3041_s2 + $0x18] sm:$0xff]  ;;  %v514_v25 = vld [vmem:[%s3041_s2] sm:$0xff]  ;;  %v515_v26 = vld [vmem:[%s3041_s2 + $0x8] sm:$0xff] }
  0x1d   : > { %v690_v40 = vld [vmem:[%s3044_s5 + $0x78] sm:$0xff]  ;;  %v1976_v60 = vld [vmem:[%s3065_s1] ss:$0 sm:$0xff]  ;;  %v688_v12 = vld [vmem:[%s3044_s5 + $0x68] sm:$0xff]  ;;  %s2100_s1 = sshra.s32 %s1782_s30, 4  ;;  %s2101_s1 = int_to_ptr.hbm [resolvable:$true] %s2100_s1 }
  0x1e   : > { %v444_v3 = vsel %vm443_vm0, %v441_v1, 0.0  ;;  %v447_v5 = vsel %vm443_vm0, %v442_v4, 0.0  ;;  %547 = vmatpush.msra.mxu0 %v522_v13  ;;  %570 = vmatpush.msra.mxu1 %v523_v14  ;;  %v687_v13 = vld [vmem:[%s3044_s5 + $0x60] sm:$0xff]  ;;  %v685_v14 = vld [vmem:[%s3044_s5 + $0x50] sm:$0xff]  ;;  %s2102_s20 = scalar_lea.hbm %s2101_s1, 16  ;;  %p2107_p0 = scmp.lt.s32.totalorder %s2101_s1, %s3052_s13 }
  0x1f   : > { %445 = vadd.xlane.f32.xlu0 %v444_v3  ;;  %691 = vmatpush.msra.mxu3 %v690_v40  ;;  %p2103_p11 = scmp.ne.s32.totalorder %s2101_s1, %s2102_s20  ;;  %p2108_p1 = scmp.lt.s32.totalorder %s2106_s22, %s2102_s20 }
  0x20   : > { %548 = vmatpush.msra.mxu0 %v520_v15  ;;  %571 = vmatpush.msra.mxu1 %v521_v16  ;;  %v684_v15 = vld [vmem:[%s3044_s5 + $0x48] sm:$0xff]  ;;  %v683_v16 = vld [vmem:[%s3044_s5 + $0x40] sm:$0xff] }
  0x21   : > { %p2104_p12 = pnand %p2103_p11, %p2276_p5  ;;  %p2109_p2 = por %p2108_p1, %p2107_p0 }
  0x22   : > { %549 = vmatpush.msra.mxu0 %v518_v18  ;;  %572 = vmatpush.msra.mxu1 %v519_v19  ;;  %v682_v18 = vld [vmem:[%s3044_s5 + $0x38] sm:$0xff]  ;;  %v767_v19 = vld [vmem:[%s3046_s7 + $0x70] sm:$0xff] }
  0x23   : > { %p2105_p13 = pneg %p2104_p12 }
  0x24   : > { %550 = vmatpush.msra.mxu0 %v516_v22  ;;  %573 = vmatpush.msra.mxu1 %v517_v23  ;;  %v680_v22 = vld [vmem:[%s3044_s5 + $0x28] sm:$0xff]  ;;  %v765_v23 = vld [vmem:[%s3046_s7 + $0x60] sm:$0xff] }
  0x25   : > { %p2110_p3 = pnand %p2109_p2, %p2105_p13 }
  0x26   : > { %551 = vmatpush.msra.mxu0 %v514_v25  ;;  %574 = vmatpush.msra.mxu1 %v515_v26  ;;  %v764_v25 = vld [vmem:[%s3046_s7 + $0x58] sm:$0xff] }
  0x27   : > { %448 = vadd.xlane.f32.xlu0 %v447_v5  ;;  %v678_v26 = vld [vmem:[%s3044_s5 + $0x18] sm:$0xff] }
  0x92   : > { %v446_v8 = vpop.xlane.xlu0 %445 }
  0x93   : > { %1984 = vrsqrt.f32 %v446_v8  ;;  %vm457_vm1 = vcmp.eq.f32.partialorder %v446_v8, inf  ;;  %v460_v34 = vand.u32 2147483648, %v446_v8  ;;  %vm459_vm2 = vcmp.eq.f32.partialorder %v446_v8, 0.0 }
  0x99   : > { %v1985_v17 = vpop.eup %1984 }
  0x9a   : > { %v451_v20 = vmul.f32 %v1985_v17, %v446_v8  ;;  %v449_v21 = vpop.xlane.xlu0 %448 }
  0x9b   : > { %1986 = vrsqrt.f32 %v449_v21  ;;  %vm469_vm3 = vcmp.eq.f32.partialorder %v449_v21, inf  ;;  %v472_v43 = vand.u32 2147483648, %v449_v21  ;;  %vm471_vm4 = vcmp.eq.f32.partialorder %v449_v21, 0.0 }
  0x9c   : > { %v452_v24 = vmul.f32 %v1985_v17, %v451_v20  ;;  %v681_v20 = vld [vmem:[%s3044_s5 + $0x30] sm:$0xff] }
  0x9e   : > { %v453_v27 = vmul.f32 0.5, %v452_v24  ;;  %v679_v24 = vld [vmem:[%s3044_s5 + $0x20] sm:$0xff] }
  0xa0   : > { %v454_v28 = vsub.f32 1.5, %v453_v27  ;;  %v763_v27 = vld [vmem:[%s3046_s7 + $0x50] sm:$0xff] }
  0xa1   : > { %v1987_v29 = vpop.eup %1986 }
  0xa2   : > { %v455_v30 = vmul.f32 %v1985_v17, %v454_v28  ;;  %v463_v31 = vmul.f32 %v1987_v29, %v449_v21  ;;  %v768_v17 = vld [vmem:[%s3046_s7 + $0x78] sm:$0xff]  ;;  %v677_v28 = vld [vmem:[%s3044_s5 + $0x10] sm:$0xff] }
  0xa3   : > { %769 = vmatpush.msrb.mxu0 %v768_v17 }
  0xa4   : > { %v456_v32 = vmul.f32 %v455_v30, %v446_v8  ;;  %v464_v33 = vmul.f32 %v1987_v29, %v463_v31  ;;  %v676_v30 = vld [vmem:[%s3044_s5 + $0x8] sm:$0xff]  ;;  %v761_v31 = vld [vmem:[%s3046_s7 + $0x40] sm:$0xff] }
  0xa5   : > { %770 = vmatpush.msrb.mxu0 %v767_v19  ;;  %v721_v19 = vld [vmem:[%s3045_s6 + $0x38] sm:$0xff] }
  0xa6   : > { %v458_v35 = vsel %vm457_vm1, %v446_v8, %v456_v32  ;;  %v465_v36 = vmul.f32 0.5, %v464_v33  ;;  %v1977_v32 = vld [vmem:[%s3042_s3] ss:$0 sm:$0xff] }
  0xa7   : > { %v461_v37 = vsel %vm459_vm2, %v460_v34, %v458_v35  ;;  %v675_v33 = vld [vmem:[%s3044_s5] sm:$0xff] }
  0xa8   : > { %v474_v38 = vmax.f32 %v461_v37, 1e-12  ;;  %v466_v39 = vsub.f32 1.5, %v465_v36  ;;  %v1978_v35 = vld [vmem:[%s3042_s3 + $0x1] ss:$0 sm:$0xff]  ;;  %v729_v36 = vld [vmem:[%s3045_s6 + $0x78] sm:$0xff] }
  0xa9   : > { %v760_v37 = vld [vmem:[%s3046_s7 + $0x38] sm:$0xff] }
  0xaa   : > { %1988 = vrcp.f32 %v474_v38  ;;  %v467_v41 = vmul.f32 %v1987_v29, %v466_v39  ;;  %v487_v50 = vand.u32 2147483648, %v474_v38  ;;  %v485_v52 = vand.u32 2147483647, %v474_v38  ;;  %v762_v29 = vld [vmem:[%s3046_s7 + $0x48] sm:$0xff] }
  0xab   : > { %vm481_vm6 = vweird.f32 %v474_v38 }
  0xac   : > { %v468_v42 = vmul.f32 %v467_v41, %v449_v21  ;;  %v488_v55 = vor.u32 1.1754944e-38, %v487_v50  ;;  %vm486_vm8 = vcmp.eq.f32.partialorder %v485_v52, 8.507059e+37  ;;  %v1979_v41 = vld [vmem:[%s3042_s3 + $0x2] ss:$0 sm:$0xff]  ;;  %v727_v50 = vld [vmem:[%s3045_s6 + $0x68] sm:$0xff] }
  0xae   : > { %v470_v44 = vsel %vm469_vm3, %v449_v21, %v468_v42  ;;  %v766_v21 = vld [vmem:[%s3046_s7 + $0x68] sm:$0xff]  ;;  %v728_v42 = vld [vmem:[%s3045_s6 + $0x70] sm:$0xff] }
  0xaf   : > { %v473_v45 = vsel %vm471_vm4, %v472_v43, %v470_v44  ;;  %771 = vmatpush.msrb.mxu0 %v766_v21  ;;  %v759_v43 = vld [vmem:[%s3046_s7 + $0x30] sm:$0xff] }
  0xb0   : > { %v1989_v46 = vpop.eup %1988  ;;  %v475_v47 = vmax.f32 %v473_v45, 1e-12  ;;  %v720_v21 = vld [vmem:[%s3045_s6 + $0x30] sm:$0xff] }
  0xb1   : > { %v477_v48 = vmul.f32 %v1989_v46, %v474_v38  ;;  %vm482_vm5 = vweird.f32 %v1989_v46  ;;  %772 = vmatpush.msrb.mxu0 %v765_v23 }
  0xb2   : > { %1990 = vrcp.f32 %v475_v47  ;;  %vm483_vm7 = vmor %vm481_vm6, %vm482_vm5  ;;  %v502_v62 = vand.u32 2147483648, %v475_v47  ;;  %v500_v3 = vand.u32 2147483647, %v475_v47  ;;  %vm496_vm10 = vweird.f32 %v475_v47 }
  0xb3   : > { %v478_v49 = vsub.f32 1.0, %v477_v48  ;;  %773 = vmatpush.msrb.mxu0 %v764_v25 }
  0xb4   : > { %v503_v6 = vor.u32 1.1754944e-38, %v502_v62  ;;  %vm501_vm12 = vcmp.eq.f32.partialorder %v500_v3, 8.507059e+37 }
  0xb5   : > { %v479_v51 = vmul.f32 %v1989_v46, %v478_v49  ;;  %774 = vmatpush.msrb.mxu0 %v763_v27  ;;  %v1980_v49 = vld [vmem:[%s3042_s3 + $0x3] ss:$0 sm:$0xff]  ;;  %v717_v27 = vld [vmem:[%s3045_s6 + $0x18] sm:$0xff] }
  0xb7   : > { %v480_v53 = vadd.f32 %v1989_v46, %v479_v51  ;;  %775 = vmatpush.msrb.mxu0 %v762_v29  ;;  %v758_v51 = vld [vmem:[%s3046_s7 + $0x28] sm:$0xff]  ;;  %v716_v29 = vld [vmem:[%s3045_s6 + $0x10] sm:$0xff] }
  0xb8   : > { %v1991_v54 = vpop.eup %1990 }
  0xb9   : > { %v484_v56 = vsel %vm483_vm7, %v1989_v46, %v480_v53  ;;  %v492_v57 = vmul.f32 %v1991_v54, %v475_v47  ;;  %vm497_vm9 = vweird.f32 %v1991_v54  ;;  %776 = vmatpush.msrb.mxu0 %v761_v31  ;;  %v714_v31 = vld [vmem:[%s3045_s6] sm:$0xff] }
  0xba   : > { %v489_v58 = vsel %vm486_vm8, %v488_v55, %v484_v56  ;;  %vm498_vm11 = vmor %vm496_vm10, %vm497_vm9  ;;  %v757_v55 = vld [vmem:[%s3046_s7 + $0x20] sm:$0xff]  ;;  %vm804_vm9 = vcmask 1043456   ;;  %vm797_vm10 = vcmask 31744  }
  0xbb   : > { %v490_v59 = vmul.f32 8.0, %v489_v58  ;;  %v493_v61 = vsub.f32 1.0, %v492_v57  ;;  %777 = vmatpush.msrb.mxu0 %v760_v37  ;;  %v1981_v58 = vld [vmem:[%s3043_s4] ss:$0 sm:$0xff] }
  0xbd   : > { %v506_v63 = vmul.f32 %v490_v59, %v2294_v0  ;;  %v494_v1 = vmul.f32 %v1991_v54, %v493_v61  ;;  %v689_v0 = vld [vmem:[%s3044_s5 + $0x70] sm:$0xff]  ;;  %778 = vmatpush.msrb.mxu0 %v759_v43  ;;  %v756_v61 = vld [vmem:[%s3046_s7 + $0x18] sm:$0xff] }
  0xbe   : > { %692 = vmatpush.msra.mxu3 %v689_v0  ;;  %v723_v0 = vld [vmem:[%s3045_s6 + $0x48] sm:$0xff] }
  0xbf   : > { %v512_v4 = vmul.f32 %v1976_v60, %v506_v63  ;;  %v495_v5 = vadd.f32 %v1991_v54, %v494_v1  ;;  %779 = vmatpush.msrb.mxu0 %v758_v51 }
  0xc0   : > { %693 = vmatpush.msra.mxu3 %v688_v12  ;;  %v754_v12 = vld [vmem:[%s3046_s7 + $0x8] sm:$0xff] }
  0xc1   : > { %1851 = vmatmul.msk.f32.vlgmr.msra.gmra.mxu0 %vm443_vm0, %v512_v4  ;;  %1853 = vmatmul.msk.f32.vlgmr.msra.gmra.mxu1 %vm443_vm0, %v512_v4  ;;  %v499_v7 = vsel %vm498_vm11, %v1991_v54, %v495_v5  ;;  %v726_v54 = vld [vmem:[%s3045_s6 + $0x60] sm:$0xff]  ;;  %v724_v4 = vld [vmem:[%s3045_s6 + $0x50] sm:$0xff]  ;;  %vm915_vm11 = vcmask 130048  }
  0xc2   : > { %v504_v8 = vsel %vm501_vm12, %v503_v6, %v499_v7  ;;  %694 = vmatpush.msra.mxu3 %v687_v13  ;;  %780 = vmatpush.msrb.mxu0 %v757_v55  ;;  %v755_v5 = vld [vmem:[%s3046_s7 + $0x10] sm:$0xff] }
  0xc3   : > { %v505_v9 = vmul.f32 8.0, %v504_v8 }
  0xc4   : > { %781 = vmatpush.msrb.mxu0 %v756_v61  ;;  %v2150_v61 = vmov 4  }
  0xc5   : > { %v507_v10 = vmul.f32 %v505_v9, %v2299_v2  ;;  %v686_v2 = vld [vmem:[%s3044_s5 + $0x58] sm:$0xff]  ;;  %1947 = vset.pattern.permute.xlu0 %v2150_v61 }
  0xc6   : > { %695 = vmatpush.msra.mxu3 %v686_v2  ;;  %782 = vmatpush.msrb.mxu0 %v755_v5  ;;  %v2155_v5 = vmov 2  }
  0xc7   : > { %v513_v11 = vmul.f32 %v1976_v60, %v507_v10  ;;  %v725_v60 = vld [vmem:[%s3045_s6 + $0x58] sm:$0xff] }
  0xc8   : > { %696 = vmatpush.msra.mxu3 %v685_v14  ;;  %783 = vmatpush.msrb.mxu0 %v754_v12 }
  0xc9   : > { %1852 = vmatmul.msk.f32.gmra.mxu0 %vm443_vm0, %v513_v11  ;;  %1854 = vmatmul.msk.f32.gmra.mxu1 %vm443_vm0, %v513_v11 }
  0xca   : > { %697 = vmatpush.msra.mxu3 %v684_v15  ;;  %v722_v15 = vld [vmem:[%s3045_s6 + $0x40] sm:$0xff] }
  0xcc   : > { %698 = vmatpush.msra.mxu3 %v683_v16  ;;  %v753_v16 = vld [vmem:[%s3046_s7] sm:$0xff] }
  0xcd   : > { %784 = vmatpush.msrb.mxu0 %v753_v16 }
  0xce   : > { %699 = vmatpush.msra.mxu3 %v682_v18 }
  0xd0   : > { %700 = vmatpush.msra.mxu3 %v681_v20 }
  0xd2   : > { %701 = vmatpush.msra.mxu3 %v680_v22  ;;  %v719_v22 = vld [vmem:[%s3045_s6 + $0x28] sm:$0xff] }
  0xd4   : > { %702 = vmatpush.msra.mxu3 %v679_v24  ;;  %v718_v24 = vld [vmem:[%s3045_s6 + $0x20] sm:$0xff] }
  0xd6   : > { %703 = vmatpush.msra.mxu3 %v678_v26 }
  0xd8   : > { %704 = vmatpush.msra.mxu3 %v677_v28 }
  0xda   : > { %705 = vmatpush.msra.mxu3 %v676_v30  ;;  %v715_v30 = vld [vmem:[%s3045_s6 + $0x8] sm:$0xff] }
  0xdc   : > { %706 = vmatpush.msra.mxu3 %v675_v33 }
  0xde   : > { %730 = vmatpush.msrb.mxu3 %v729_v36 }
  0xe0   : > { %731 = vmatpush.msrb.mxu3 %v728_v42 }
  0xe2   : > { %732 = vmatpush.msrb.mxu3 %v727_v50 }
  0xe4   : > { %733 = vmatpush.msrb.mxu3 %v726_v54 }
  0xe6   : > { %734 = vmatpush.msrb.mxu3 %v725_v60 }
  0xe8   : > { %735 = vmatpush.msrb.mxu3 %v724_v4  ;;  %v2154_v4 = vmov 12  }
  0xea   : > { %736 = vmatpush.msrb.mxu3 %v723_v0  ;;  %v2160_v0 = vmov 6  }
  0xec   : > { %737 = vmatpush.msrb.mxu3 %v722_v15 }
  0xee   : > { %738 = vmatpush.msrb.mxu3 %v721_v19  ;;  %v2164_v19 = vmov 15  }
  0xf0   : > { %739 = vmatpush.msrb.mxu3 %v720_v21 }
  0xf2   : > { %740 = vmatpush.msrb.mxu3 %v719_v22  ;;  %v2165_v22 = vmov 14  }
  0xf4   : > { %741 = vmatpush.msrb.mxu3 %v718_v24 }
  0xf6   : > { %742 = vmatpush.msrb.mxu3 %v717_v27 }
  0xf8   : > { %743 = vmatpush.msrb.mxu3 %v716_v29 }
  0xfa   : > { %744 = vmatpush.msrb.mxu3 %v715_v30 }
  0xfc   : > { %745 = vmatpush.msrb.mxu3 %v714_v31 }
 0x13e   : > { %v553_v34 = vpop.f32.mrf.mxu0 }
 0x13f   : > { %v585_v38 = vrot.slane %v553_v34, 5  ;;  %v598_v39 = vrot.slane %v553_v34, 6  ;;  %v611_v40 = vrot.slane %v553_v34, 7  ;;  %v625_v57 = vmul.f32 %v1980_v49, %v553_v34 }
 0x141   : > { %v590_v44 = vsel %vm584_vm13, 0.0, %v585_v38  ;;  %v603_v45 = vsel %vm597_vm14, 0.0, %v598_v39  ;;  %v616_v46 = vsel %vm610_vm15, 0.0, %v611_v40 }
 0x142   : > { %v593_v47 = vmul.f32 %v1977_v32, %v590_v44  ;;  %v606_v48 = vmul.f32 %v1978_v35, %v603_v45  ;;  %v619_v53 = vmul.f32 %v1979_v41, %v616_v46 }
 0x144   : > { %v608_v52 = vadd.f32 %v606_v48, %v593_v47 }
 0x146   : > { %v621_v56 = vadd.f32 %v619_v53, %v608_v52  ;;  %v556_v59 = vpop.f32.mrf.mxu0 }
 0x147   : > { %v586_v62 = vrot.slane %v556_v59, 5  ;;  %v599_v63 = vrot.slane %v556_v59, 6  ;;  %v612_v1 = vrot.slane %v556_v59, 7  ;;  %v626_v18 = vmul.f32 %v1980_v49, %v556_v59 }
 0x148   : > { %v627_v3 = vadd.f32 %v625_v57, %v621_v56  ;;  %v792_v56 = vld [vmem:[%s3047_s8] sm:$0xf] }
 0x149   : > { %v587_v6 = vsel %vm584_vm13, %v585_v38, %v586_v62  ;;  %v600_v7 = vsel %vm597_vm14, %v598_v39, %v599_v63  ;;  %v613_v8 = vsel %vm610_vm15, %v611_v40, %v612_v1  ;;  %1857 = vmatpush.msk.msrb.mxu1 %vm804_vm9, %v792_v56  ;;  %v2151_v62 = vmov 0  }
 0x14a   : > { %v633_v9 = vadd.f32 %v1981_v58, %v627_v3  ;;  %v594_v10 = vmul.f32 %v1977_v32, %v587_v6  ;;  %v607_v11 = vmul.f32 %v1978_v35, %v600_v7  ;;  %v620_v14 = vmul.f32 %v1979_v41, %v613_v8  ;;  %1943 = vset.pattern.permute.xlu2 %v2151_v62 }
 0x14b   : > { %v2152_v63 = vmov 1   ;;  %v2153_v3 = vmov 7   ;;  %v2156_v7 = vmov 10   ;;  %v2157_v8 = vmov 3  }
 0x14c   : > { %v1855_v13 = vmul.f32 -1.442695, %v633_v9  ;;  %v609_v2 = vadd.f32 %v607_v11, %v594_v10  ;;  %v2158_v10 = vmov 5   ;;  %v2159_v11 = vmov 11  }
 0x14e   : > { %1992 = vpow2.f32 %v1855_v13  ;;  %v622_v17 = vadd.f32 %v620_v14, %v609_v2  ;;  %v2161_v13 = vmov 13   ;;  %v2162_v2 = vmov 9   ;;  %v1982_v14 = vld [vmem:[%s3048_s9] ss:$0 sm:$0xff] }
 0x150   : > { %v628_v20 = vadd.f32 %v626_v18, %v622_v17  ;;  %v2163_v18 = vmov 8  }
 0x152   : > { %v634_v23 = vadd.f32 %v1981_v58, %v628_v20 }
 0x154   : > { %v1993_v25 = vpop.eup %1992  ;;  %v1856_v26 = vmul.f32 -1.442695, %v634_v23 }
 0x155   : > { %v641_v28 = vadd.f32 1.0, %v1993_v25  ;;  %v849_v25 = vld [vmem:[%s3049_s10] sm:$0xff] }
 0x156   : > { %1994 = vpow2.f32 %v1856_v26  ;;  %v851_v27 = vmul.f32 1.442695, %v849_v25 }
 0x157   : > { %1996 = vrcp.f32 %v641_v28  ;;  %v654_v37 = vand.u32 2147483648, %v641_v28  ;;  %v652_v39 = vand.u32 2147483647, %v641_v28  ;;  %vm648_vm2 = vweird.f32 %v641_v28 }
 0x159   : > { %v655_v42 = vor.u32 1.1754944e-38, %v654_v37  ;;  %vm653_vm4 = vcmp.eq.f32.partialorder %v652_v39, 8.507059e+37 }
 0x15c   : > { %v1995_v32 = vpop.eup %1994 }
 0x15d   : > { %v1997_v33 = vpop.eup %1996  ;;  %v642_v34 = vadd.f32 1.0, %v1995_v32 }
 0x15e   : > { %v644_v35 = vmul.f32 %v1997_v33, %v641_v28  ;;  %vm649_vm1 = vweird.f32 %v1997_v33 }
 0x15f   : > { %1998 = vrcp.f32 %v642_v34  ;;  %vm650_vm3 = vmor %vm648_vm2, %vm649_vm1  ;;  %v669_v48 = vand.u32 2147483648, %v642_v34  ;;  %v667_v50 = vand.u32 2147483647, %v642_v34  ;;  %vm663_vm6 = vweird.f32 %v642_v34 }
 0x160   : > { %v645_v36 = vsub.f32 1.0, %v644_v35 }
 0x161   : > { %v670_v52 = vor.u32 1.1754944e-38, %v669_v48  ;;  %vm668_vm8 = vcmp.eq.f32.partialorder %v667_v50, 8.507059e+37 }
 0x162   : > { %v646_v38 = vmul.f32 %v1997_v33, %v645_v36 }
 0x164   : > { %v647_v40 = vadd.f32 %v1997_v33, %v646_v38 }
 0x165   : > { %v1999_v41 = vpop.eup %1998 }
 0x166   : > { %v651_v43 = vsel %vm650_vm3, %v1997_v33, %v647_v40  ;;  %v659_v44 = vmul.f32 %v1999_v41, %v642_v34  ;;  %vm664_vm5 = vweird.f32 %v1999_v41  ;;  %vm1660_vm3 = vcmask 1044480  }
 0x167   : > { %v656_v45 = vsel %vm653_vm4, %v655_v42, %v651_v43  ;;  %vm665_vm7 = vmor %vm663_vm6, %vm664_vm5  ;;  %vm1662_vm4 = vcmask 1045504   ;;  %vm1664_vm6 = vcmask 1046528  }
 0x168   : > { %v2527_v46 = vmul.f32 %v656_v45, %v633_v9  ;;  %v660_v47 = vsub.f32 1.0, %v659_v44  ;;  %v2560_v9 = vpop.f32.mrf.mxu1 }
 0x16a   : > { %v661_v49 = vmul.f32 %v1999_v41, %v660_v47  ;;  %707 = vmatmul.f32.vlgmr.msra.gmra.mxu3 %v2527_v46  ;;  %785 = vmatmul.f32.vlgmr.msrb.gmra.mxu0 %v2527_v46 }
 0x16c   : > { %v662_v51 = vadd.f32 %v1999_v41, %v661_v49 }
 0x16e   : > { %v666_v53 = vsel %vm665_vm7, %v1999_v41, %v662_v51 }
 0x16f   : > { %v671_v54 = vsel %vm668_vm8, %v670_v52, %v666_v53 }
 0x170   : > { %v2531_v55 = vmul.f32 %v671_v54, %v634_v23  ;;  %v2566_v12 = vpop.f32.mrf.mxu1 }
 0x172   : > { %710 = vmatmul.f32.gmra.mxu3 %v2531_v55  ;;  %788 = vmatmul.f32.gmra.mxu0 %v2531_v55 }
 0x17a   : > { %746 = vmatmul.f32.vlgmr.msrb.gmra.mxu3 %v2527_v46 }
 0x182   : > { %749 = vmatmul.f32.gmra.mxu3 %v2531_v55 }
 0x1ed   : > { %v708_v57 = vpop.f32.mrf.mxu3 }
 0x1ee   : > { %1858 = vmatmul.msk.f32.vlgmr.msrb.gmra.mxu1 %vm797_vm10, %v708_v57 }
 0x1f5   : > { %v711_v58 = vpop.f32.mrf.mxu3 }
 0x1f6   : > { %1859 = vmatmul.msk.f32.gmra.mxu1 %vm797_vm10, %v711_v58 }
 0x1fd   : > { %v747_v59 = vpop.f32.mrf.mxu3 }
 0x1fe   : > { %857 = vxpose.xlu1.b32.start [1/2] (short) (narrow) %v747_v59, 16 }
 0x205   : > { %v750_v60 = vpop.f32.mrf.mxu3 }
 0x206   : > { %858 = vxpose.xlu1.b32.end [2/2] (short) (narrow) %v750_v60, 16 }
 0x259   : > { %1944 = vset.pattern.permute.xlu1 %v2152_v63 }
 0x26b   : > { %v825_v15 = vpop.f32.mrf.mxu1 }
 0x26c   : > { %v826_v16 = vadd.f32 %v1982_v14, %v825_v15 }
 0x26e   : > { %v833_v17 = vand.u32 2147483647, %v826_v16  ;;  %v831_v32 = vmax.f32 %v826_v16, 0.0 }
 0x270   : > { %v835_v20 = vsub.f32 0.0, %v833_v17 }
 0x272   : > { %v837_v21 = vmul.f32 1.442695, %v835_v20 }
 0x273   : > { %v828_v26 = vpop.f32.mrf.mxu1 }
 0x274   : > { %2000 = vpow2.f32 %v837_v21  ;;  %v2590_v29 = vadd.f32 %v1982_v14, %v828_v26 }
 0x276   : > { %v834_v31 = vand.u32 2147483647, %v2590_v29 }
 0x278   : > { %v836_v35 = vsub.f32 0.0, %v834_v31 }
 0x27a   : > { %v2001_v23 = vpop.eup %2000  ;;  %v839_v38 = vmul.f32 1.442695, %v836_v35 }
 0x27b   : > { %v841_v24 = vadd.f32 1.0, %v2001_v23  ;;  %v832_v23 = vmax.f32 %v2590_v29, 0.0 }
 0x27d   : > { %2002 = vlog2.f32 %v841_v24 }
 0x27e   : > { %2004 = vpow2.f32 %v851_v27 }
 0x27f   : > { %2006 = vpow2.f32 %v839_v38 }
 0x283   : > { %v2003_v28 = vpop.eup %2002 }
 0x284   : > { %v844_v30 = vmul.f32 0.6931472, %v2003_v28  ;;  %v2005_v34 = vpop.eup %2004 }
 0x285   : > { %v2597_v36 = vsub.f32 0.0, %v2005_v34  ;;  %v2007_v43 = vpop.eup %2006 }
 0x286   : > { %v2595_v33 = vadd.f32 %v844_v30, %v831_v32  ;;  %v842_v49 = vadd.f32 1.0, %v2007_v43 }
 0x288   : > { %v891_v37 = vperm.slane %v2595_v33, 0  ;;  %v939_v42 = vperm.slane %v2595_v33, 1  ;;  %v984_v47 = vperm.slane %v2595_v33, 2  ;;  %v2613_v48 = vmul.f32 %v2595_v33, %v2527_v46 }
 0x289   : > { %v1029_v51 = vperm.slane %v2595_v33, 3  ;;  %v1074_v59 = vperm.slane %v2595_v33, 4  ;;  %v1164_v20 = vperm.slane %v2595_v33, 6  ;;  %v1209_v29 = vperm.slane %v2595_v33, 7 }
 0x28a   : > { %v892_v40 = vmul.f32 %v891_v37, %v2597_v36  ;;  %v940_v45 = vmul.f32 %v939_v42, %v2597_v36  ;;  %v985_v52 = vmul.f32 %v984_v47, %v2597_v36  ;;  %v910_v53 = vperm.slane %v2613_v48, 0 }
 0x28b   : > { %v1030_v58 = vmul.f32 %v1029_v51, %v2597_v36  ;;  %v1001_v24 = vperm.slane %v2613_v48, 2  ;;  %v1165_v34 = vmul.f32 %v1164_v20, %v2597_v36 }
 0x28c   : > { %v894_v41 = vmul.f32 1.442695, %v892_v40  ;;  %v942_v50 = vmul.f32 1.442695, %v940_v45  ;;  %v987_v57 = vmul.f32 1.442695, %v985_v52 }
 0x28d   : > { %v1167_v43 = vmul.f32 1.442695, %v1165_v34 }
 0x28e   : > { %2008 = vpow2.f32 %v894_v41 }
 0x28f   : > { %2010 = vlog2.f32 %v842_v49  ;;  %v1091_v49 = vperm.slane %v2613_v48, 4 }
 0x290   : > { %2012 = vpow2.f32 %v942_v50 }
 0x291   : > { %2014 = vpow2.f32 %v987_v57 }
 0x294   : > { %v2009_v54 = vpop.eup %2008 }
 0x295   : > { %v898_v60 = vmul.f32 0.0, %v2009_v54 }
 0x2a2   : > { %v2543_v1 = vpop.trf.xlu1 }
 0x2a3   : > { %1084 = vperm.xlu0 %1947, %v2543_v1   ;;  %949 = vperm.xlu1 %1944, %v2543_v1  }
 0x2a4   : > { %902 = vperm.xlu2 %1943, %v2543_v1  }
 0x2aa   : > { %v2554_v6 = vpop.trf.xlu1 }
 0x2ab   : > { %1950 = vset.pattern.permute.xlu0 %v2153_v3  ;;  %1965 = vset.pattern.permute.xlu1 %v2154_v4 }
 0x2ac   : > { %1945 = vset.pattern.permute.xlu2 %v2155_v5  ;;  %1219 = vperm.xlu0 %1950, %v2543_v1  }
 0x2ad   : > { %1444 = vperm.xlu1 %1965, %v2543_v1   ;;  %994 = vperm.xlu2 %1945, %v2543_v1  }
 0x2b4   : > { %1955 = vset.pattern.permute.xlu0 %v2152_v63  ;;  %v2011_v63 = vpop.eup %2010 }
 0x2b5   : > { %1966 = vset.pattern.permute.xlu1 %v2156_v7  ;;  %1946 = vset.pattern.permute.xlu2 %v2157_v8 }
 0x2b6   : > { %1039 = vperm.xlu2 %1946, %v2543_v1   ;;  %1358 = vperm.xlu1 %1966, %v2554_v6  }
 0x2b7   : > { %953 = vperm.xlu0 %1955, %v2554_v6  }
 0x2be   : > { %1948 = vset.pattern.permute.xlu2 %v2158_v10  ;;  %1967 = vset.pattern.permute.xlu1 %v2159_v11 }
 0x2bf   : > { %1960 = vset.pattern.permute.xlu0 %v2160_v0  ;;  %1129 = vperm.xlu2 %1948, %v2543_v1  }
 0x2c0   : > { %1403 = vperm.xlu1 %1967, %v2554_v6   ;;  %1178 = vperm.xlu0 %1960, %v2554_v6  }
 0x2c7   : > { %1949 = vset.pattern.permute.xlu2 %v2160_v0  ;;  %v2013_v0 = vpop.eup %2012 }
 0x2c8   : > { %1968 = vset.pattern.permute.xlu1 %v2161_v13  ;;  %1963 = vset.pattern.permute.xlu0 %v2162_v2  ;;  %v2015_v26 = vpop.eup %2014 }
 0x2c9   : > { %1174 = vperm.xlu2 %1949, %v2543_v1   ;;  %1489 = vperm.xlu1 %1968, %v2543_v1  }
 0x2ca   : > { %1313 = vperm.xlu0 %1963, %v2554_v6  }
 0x2d1   : > { %1951 = vset.pattern.permute.xlu2 %v2163_v18  ;;  %1973 = vset.pattern.permute.xlu1 %v2164_v19 }
 0x2d2   : > { %1964 = vset.pattern.permute.xlu0 %v2159_v11  ;;  %1264 = vperm.xlu2 %1951, %v2543_v1   ;;  %v956_v11 = vperm.slane %v2613_v48, 1 }
 0x2d3   : > { %1583 = vperm.xlu1 %1973, %v2554_v6   ;;  %1399 = vperm.xlu0 %1964, %v2543_v1  }
 0x2da   : > { %1952 = vset.pattern.permute.xlu2 %v2162_v2 }
 0x2db   : > { %1971 = vset.pattern.permute.xlu0 %v2165_v22  ;;  %1309 = vperm.xlu2 %1952, %v2543_v1  }
 0x2dc   : > { %1538 = vperm.xlu0 %1971, %v2554_v6  }
 0x2e3   : > { %1953 = vset.pattern.permute.xlu2 %v2156_v7  ;;  %v1075_v7 = vmul.f32 %v1074_v59, %v2597_v36 }
 0x2e4   : > { %1354 = vperm.xlu2 %1953, %v2543_v1   ;;  %1975 = vset.pattern.permute.xlu0 %v2164_v19 }
 0x2e5   : > { %v1077_v17 = vmul.f32 1.442695, %v1075_v7 }
 0x2ec   : > { %1954 = vset.pattern.permute.xlu2 %v2151_v62 }
 0x2ed   : > { %907 = vperm.xlu2 %1954, %v2554_v6  }
 0x2f5   : > { %1956 = vset.pattern.permute.xlu2 %v2155_v5  ;;  %v1032_v5 = vmul.f32 1.442695, %v1030_v58 }
 0x2f6   : > { %998 = vperm.xlu2 %1956, %v2554_v6  }
 0x2f7   : > { %2016 = vpow2.f32 %v1032_v5  ;;  %v1136_v5 = vperm.slane %v2613_v48, 5 }
 0x2f8   : > { %2018 = vpow2.f32 %v1077_v17 }
 0x2fd   : > { %v2017_v38 = vpop.eup %2016 }
 0x2fe   : > { %1957 = vset.pattern.permute.xlu2 %v2157_v8  ;;  %v903_v39 = vpop.permute.xlu2 %902  ;;  %v1119_v8 = vperm.slane %v2595_v33, 5  ;;  %v2019_v52 = vpop.eup %2018 }
 0x2ff   : > { %1043 = vperm.xlu2 %1957, %v2554_v6   ;;  %v911_v56 = vmul.f32 %v910_v53, %v903_v39 }
 0x300   : > { %v1120_v21 = vmul.f32 %v1119_v8, %v2597_v36 }
 0x301   : > { %v2629_v62 = vadd.f32 %v911_v56, %v898_v60  ;;  %v850_v56 = vld [vmem:[%s3049_s10 + $0x8] sm:$0xff] }
 0x302   : > { %v1122_v32 = vmul.f32 1.442695, %v1120_v21 }
 0x303   : > { %v946_v16 = vmul.f32 %v2013_v0, %v2629_v62  ;;  %v853_v0 = vmul.f32 1.442695, %v850_v56 }
 0x304   : > { %2020 = vpow2.f32 %v1122_v32 }
 0x305   : > { %2022 = vpow2.f32 %v1167_v43 }
 0x307   : > { %1958 = vset.pattern.permute.xlu2 %v2150_v61  ;;  %v995_v44 = vpop.permute.xlu2 %994 }
 0x308   : > { %1088 = vperm.xlu2 %1958, %v2554_v6   ;;  %v1002_v30 = vmul.f32 %v1001_v24, %v995_v44  ;;  %v1210_v44 = vmul.f32 %v1209_v29, %v2597_v36 }
 0x30a   : > { %v1212_v60 = vmul.f32 1.442695, %v1210_v44  ;;  %v2021_v7 = vpop.eup %2020 }
 0x30b   : > { %v2023_v21 = vpop.eup %2022 }
 0x30c   : > { %2024 = vpow2.f32 %v1212_v60 }
 0x30d   : > { %2026 = vpow2.f32 %v853_v0 }
 0x310   : > { %1959 = vset.pattern.permute.xlu2 %v2158_v10  ;;  %v1040_v61 = vpop.permute.xlu2 %1039  ;;  %v846_v10 = vmul.f32 0.6931472, %v2011_v63 }
 0x311   : > { %1133 = vperm.xlu2 %1959, %v2554_v6  }
 0x312   : > { %v2648_v28 = vadd.f32 %v846_v10, %v832_v23 }
 0x314   : > { %v1254_v45 = vperm.slane %v2648_v28, 0  ;;  %v2704_v32 = vmul.f32 %v2648_v28, %v2531_v55 }
 0x315   : > { %v1085_v2 = vpop.permute.xlu0 %1084  ;;  %v950_v14 = vpop.permute.xlu1 %949 }
 0x316   : > { %v957_v15 = vmul.f32 %v956_v11, %v950_v14  ;;  %v1092_v54 = vmul.f32 %v1091_v49, %v1085_v2  ;;  %v1255_v63 = vmul.f32 %v1254_v45, %v2597_v36 }
 0x318   : > { %v2645_v25 = vadd.f32 %v957_v15, %v946_v16  ;;  %v1257_v10 = vmul.f32 1.442695, %v1255_v63  ;;  %v1181_v16 = vperm.slane %v2613_v48, 6 }
 0x319   : > { %1961 = vset.pattern.permute.xlu2 %v2153_v3  ;;  %v1130_v27 = vpop.permute.xlu2 %1129  ;;  %v1046_v3 = vperm.slane %v2613_v48, 3 }
 0x31a   : > { %1223 = vperm.xlu2 %1961, %v2554_v6   ;;  %v991_v31 = vmul.f32 %v2015_v26, %v2645_v25  ;;  %v1137_v2 = vmul.f32 %v1136_v5, %v1130_v27  ;;  %2028 = vpow2.f32 %v1257_v10 }
 0x31b   : > { %v1047_v39 = vmul.f32 %v1046_v3, %v1040_v61  ;;  %v1299_v61 = vperm.slane %v2648_v28, 1 }
 0x31c   : > { %v2659_v35 = vadd.f32 %v1002_v30, %v991_v31  ;;  %v1226_v31 = vperm.slane %v2613_v48, 7 }
 0x31d   : > { %v1300_v15 = vmul.f32 %v1299_v61, %v2597_v36 }
 0x31e   : > { %v1036_v40 = vmul.f32 %v2017_v38, %v2659_v35  ;;  %v1220_v41 = vpop.permute.xlu0 %1219 }
 0x31f   : > { %v1302_v30 = vmul.f32 1.442695, %v1300_v15  ;;  %v2710_v43 = vpop.permute.xlu1 %1444 }
 0x320   : > { %v2669_v50 = vadd.f32 %v1047_v39, %v1036_v40  ;;  %v1344_v39 = vperm.slane %v2648_v28, 2  ;;  %v2025_v40 = vpop.eup %2024 }
 0x321   : > { %2030 = vpow2.f32 %v1302_v30 }
 0x322   : > { %1962 = vset.pattern.permute.xlu2 %v2163_v18  ;;  %v1081_v57 = vmul.f32 %v2019_v52, %v2669_v50  ;;  %v2027_v52 = vpop.eup %2026 }
 0x323   : > { %v1175_v58 = vpop.permute.xlu2 %1174  ;;  %1268 = vperm.xlu2 %1962, %v2554_v6   ;;  %v2029_v60 = vpop.eup %2028 }
 0x324   : > { %v2684_v18 = vadd.f32 %v1092_v54, %v1081_v57  ;;  %v1182_v26 = vmul.f32 %v1181_v16, %v1175_v58  ;;  %v1271_v54 = vperm.slane %v2704_v32, 0  ;;  %v1389_v57 = vperm.slane %v2648_v28, 3 }
 0x325   : > { %v1345_v58 = vmul.f32 %v1344_v39, %v2597_v36 }
 0x326   : > { %v1126_v14 = vmul.f32 %v2021_v7, %v2684_v18  ;;  %v1390_v15 = vmul.f32 %v1389_v57, %v2597_v36 }
 0x327   : > { %v1347_v10 = vmul.f32 1.442695, %v1345_v58 }
 0x328   : > { %v2693_v17 = vadd.f32 %v1137_v2, %v1126_v14  ;;  %v3054_v2 = vperm.slane %v2704_v32, 1 }
 0x329   : > { %v2695_v23 = vpop.permute.xlu0 %953  ;;  %2032 = vpow2.f32 %v1347_v10 }
 0x32a   : > { %v1171_v27 = vmul.f32 %v2023_v21, %v2693_v17  ;;  %v2031_v21 = vpop.eup %2030 }
 0x32b   : > { %1969 = vset.pattern.permute.xlu2 %v2154_v4  ;;  %v1227_v4 = vmul.f32 %v1226_v31, %v1220_v41  ;;  %v2726_v41 = vsub.f32 0.0, %v2027_v52 }
 0x32c   : > { %v1265_v34 = vpop.permute.xlu2 %1264  ;;  %1448 = vperm.xlu2 %1969, %v2554_v6   ;;  %v2707_v38 = vadd.f32 %v1182_v26, %v1171_v27 }
 0x32d   : > { %v1272_v63 = vmul.f32 %v1271_v54, %v1265_v34  ;;  %v2743_v34 = vpop.permute.xlu1 %1358  ;;  %v1256_v33 = vmul.f32 %v1254_v45, %v2726_v41 }
 0x32e   : > { %v1216_v44 = vmul.f32 %v2025_v40, %v2707_v38  ;;  %v1434_v40 = vperm.slane %v2648_v28, 4 }
 0x330   : > { %v2716_v56 = vadd.f32 %v1227_v4, %v1216_v44  ;;  %v1392_v44 = vmul.f32 1.442695, %v1390_v15  ;;  %v1435_v58 = vmul.f32 %v1434_v40, %v2597_v36  ;;  %v3057_v15 = vperm.slane %v2648_v28, 6 }
 0x332   : > { %v2724_v7 = vpop.permute.xlu0 %1178  ;;  %v1261_v0 = vmul.f32 %v2029_v60, %v2716_v56  ;;  %2034 = vpow2.f32 %v1392_v44 }
 0x334   : > { %1970 = vset.pattern.permute.xlu2 %v2161_v13  ;;  %v2731_v14 = vadd.f32 %v1272_v63, %v1261_v0  ;;  %v893_v13 = vmul.f32 %v891_v37, %v2726_v41  ;;  %v3055_v37 = vperm.slane %v2704_v32, 2  ;;  %v941_v63 = vmul.f32 %v939_v42, %v2726_v41  ;;  %v2033_v0 = vpop.eup %2032 }
 0x335   : > { %v1310_v26 = vpop.permute.xlu2 %1309  ;;  %1493 = vperm.xlu2 %1970, %v2554_v6   ;;  %v3056_v6 = vperm.slane %v2648_v28, 5 }
 0x336   : > { %v1317_v27 = vmul.f32 %v3054_v2, %v1310_v26  ;;  %v1306_v30 = vmul.f32 %v2031_v21, %v2731_v14  ;;  %v896_v52 = vmul.f32 1.442695, %v893_v13  ;;  %v2767_v13 = vpop.permute.xlu1 %1403  ;;  %v944_v42 = vmul.f32 1.442695, %v941_v63 }
 0x338   : > { %v2746_v4 = vadd.f32 %v1317_v27, %v1306_v30  ;;  %2036 = vpow2.f32 %v896_v52  ;;  %v1437_v27 = vmul.f32 1.442695, %v1435_v58  ;;  %v986_v30 = vmul.f32 %v984_v47, %v2726_v41  ;;  %v2035_v52 = vpop.eup %2034 }
 0x339   : > { %v1525_v58 = vmul.f32 %v3057_v15, %v2597_v36 }
 0x33a   : > { %v1351_v26 = vmul.f32 %v2033_v0, %v2746_v4  ;;  %2038 = vpow2.f32 %v1437_v27  ;;  %v989_v63 = vmul.f32 1.442695, %v986_v30  ;;  %v1451_v27 = vperm.slane %v2704_v32, 4 }
 0x33b   : > { %2040 = vpow2.f32 %v944_v42 }
 0x33c   : > { %v2752_v60 = vpop.permute.xlu0 %1313 }
 0x33d   : > { %1972 = vset.pattern.permute.xlu2 %v2165_v22  ;;  %v1480_v22 = vmul.f32 %v3056_v6, %v2597_v36 }
 0x33e   : > { %v1355_v10 = vpop.permute.xlu2 %1354  ;;  %1534 = vperm.xlu2 %1972, %v2543_v1   ;;  %v2037_v0 = vpop.eup %2036 }
 0x33f   : > { %v1362_v21 = vmul.f32 %v3055_v37, %v1355_v10  ;;  %v1482_v10 = vmul.f32 1.442695, %v1480_v22  ;;  %v1406_v37 = vperm.slane %v2704_v32, 3  ;;  %v899_v22 = vmul.f32 0.0, %v2037_v0 }
 0x340   : > { %v2039_v42 = vpop.eup %2038  ;;  %v1031_v0 = vmul.f32 %v1029_v51, %v2726_v41 }
 0x341   : > { %v2772_v44 = vadd.f32 %v1362_v21, %v1351_v26  ;;  %2042 = vpow2.f32 %v1482_v10  ;;  %v1527_v26 = vmul.f32 1.442695, %v1525_v58  ;;  %v2041_v30 = vpop.eup %2040  ;;  %v1496_v10 = vperm.slane %v2704_v32, 5  ;;  %v1490_v58 = vpop.permute.xlu1 %1489 }
 0x342   : > { %2044 = vpow2.f32 %v989_v63 }
 0x343   : > { %v1396_v2 = vmul.f32 %v2035_v52, %v2772_v44  ;;  %2046 = vpow2.f32 %v1527_v26 }
 0x345   : > { %v1400_v6 = vpop.permute.xlu0 %1399 }
 0x346   : > { %v1407_v47 = vmul.f32 %v1406_v37, %v1400_v6  ;;  %1974 = vset.pattern.permute.xlu2 %v2164_v19  ;;  %v1452_v6 = vmul.f32 %v1451_v27, %v2710_v43 }
 0x347   : > { %1579 = vperm.xlu2 %1974, %v2543_v1   ;;  %v908_v21 = vpop.permute.xlu2 %907  ;;  %v2043_v63 = vpop.eup %2042 }
 0x348   : > { %v912_v52 = vmul.f32 %v910_v53, %v908_v21  ;;  %v2786_v15 = vadd.f32 %v1407_v47, %v1396_v2  ;;  %v958_v53 = vmul.f32 %v956_v11, %v2695_v23  ;;  %v2801_v47 = vpop.f32.mrf.mxu0  ;;  %v1497_v21 = vmul.f32 %v1496_v10, %v1490_v58  ;;  %v2045_v26 = vpop.eup %2044 }
 0x349   : > { %v1034_v11 = vmul.f32 1.442695, %v1031_v0  ;;  %v1076_v58 = vmul.f32 %v1074_v59, %v2726_v41  ;;  %v1121_v59 = vmul.f32 %v1119_v8, %v2726_v41 }
 0x34a   : > { %v914_v19 = vadd.f32 %v912_v52, %v899_v22  ;;  %v1441_v1 = vmul.f32 %v2039_v42, %v2786_v15 }
 0x34b   : > { %2048 = vpow2.f32 %v1034_v11  ;;  %v1079_v0 = vmul.f32 1.442695, %v1076_v58 }
 0x34c   : > { %933 = vmatpush.msra.mxu1 %v914_v19  ;;  %v947_v2 = vmul.f32 %v2041_v30, %v914_v19  ;;  %v2799_v43 = vadd.f32 %v1452_v6, %v1441_v1  ;;  %v2047_v6 = vpop.eup %2046  ;;  %v961_v1 = vrot.slane %v2801_v47, 1 }
 0x34d   : > { %2050 = vpow2.f32 %v1079_v0 }
 0x34e   : > { %934 = vmatpush.msra.mxu1 %v2629_v62  ;;  %v960_v22 = vadd.f32 %v958_v53, %v947_v2  ;;  %v1486_v51 = vmul.f32 %v2043_v63, %v2799_v43  ;;  %v1006_v2 = vrot.slane %v2801_v47, 2 }
 0x34f   : > { %1860 = vmatmul.msk.f32.vlgmr.msra.gmra.mxu1 %vm915_vm11, %v2801_v47 }
 0x350   : > { %978 = vmatpush.msra.mxu2 %v960_v22  ;;  %v999_v23 = vpop.permute.xlu2 %998  ;;  %v992_v52 = vmul.f32 %v2045_v26, %v960_v22  ;;  %v2809_v42 = vadd.f32 %v1497_v21, %v1486_v51  ;;  %v1124_v22 = vmul.f32 1.442695, %v1121_v59  ;;  %v1346_v59 = vmul.f32 %v1344_v39, %v2726_v41 }
 0x351   : > { %v1003_v19 = vmul.f32 %v1001_v24, %v999_v23  ;;  %v2049_v24 = vpop.eup %2048 }
 0x352   : > { %979 = vmatpush.msra.mxu2 %v2645_v25  ;;  %v2816_v62 = vmul.f32 %v2047_v6, %v2809_v42  ;;  %2052 = vpow2.f32 %v1124_v22  ;;  %v1096_v6 = vrot.slane %v2801_v47, 4  ;;  %v1349_v48 = vmul.f32 1.442695, %v1346_v59 }
 0x353   : > { %1861 = vmatmul.msk.f32.vlgmr.msra.gmra.mxu2 %vm915_vm11, %v961_v1  ;;  %v1005_v30 = vadd.f32 %v1003_v19, %v992_v52  ;;  %v2051_v51 = vpop.eup %2050 }
 0x355   : > { %1023 = vmatpush.msrb.mxu2 %v1005_v30  ;;  %v1037_v25 = vmul.f32 %v2049_v24, %v1005_v30  ;;  %v1141_v24 = vrot.slane %v2801_v47, 5 }
 0x357   : > { %1024 = vmatpush.msrb.mxu2 %v2659_v35  ;;  %v1051_v35 = vrot.slane %v2801_v47, 3 }
 0x358   : > { %v2053_v19 = vpop.eup %2052 }
 0x359   : > { %v1044_v53 = vpop.permute.xlu2 %1043 }
 0x35a   : > { %v1048_v63 = vmul.f32 %v1046_v3, %v1044_v53  ;;  %v1166_v3 = vmul.f32 %v1164_v20, %v2726_v41 }
 0x35b   : > { %1862 = vmatmul.msk.f32.vlgmr.msrb.gmra.mxu2 %vm915_vm11, %v1006_v2 }
 0x35c   : > { %v1050_v21 = vadd.f32 %v1048_v63, %v1037_v25  ;;  %v1169_v8 = vmul.f32 1.442695, %v1166_v3  ;;  %v1301_v25 = vmul.f32 %v1299_v61, %v2726_v41  ;;  %v1231_v61 = vrot.slane %v2801_v47, 7 }
 0x35e   : > { %1068 = vmatpush.msrb.mxu1 %v1050_v21  ;;  %v1082_v11 = vmul.f32 %v2051_v51, %v1050_v21  ;;  %2054 = vpow2.f32 %v1169_v8 }
 0x360   : > { %1069 = vmatpush.msrb.mxu1 %v2669_v50  ;;  %v1211_v50 = vmul.f32 %v1209_v29, %v2726_v41  ;;  %v1183_v29 = vmul.f32 %v1181_v16, %v2724_v7  ;;  %v1186_v7 = vrot.slane %v2801_v47, 6 }
 0x361   : > { %1863 = vmatmul.msk.f32.vlgmr.msrb.gmra.mxu1 %vm915_vm11, %v1051_v35 }
 0x362   : > { %v1089_v26 = vpop.permute.xlu2 %1088  ;;  %v1214_v20 = vmul.f32 1.442695, %v1211_v50 }
 0x363   : > { %v1093_v23 = vmul.f32 %v1091_v49, %v1089_v26  ;;  %v3066_v26 = vperm.slane %v2704_v32, 1 }
 0x364   : > { %2056 = vpow2.f32 %v1214_v20  ;;  %v2055_v0 = vpop.eup %2054 }
 0x365   : > { %v1095_v52 = vadd.f32 %v1093_v23, %v1082_v11  ;;  %v2880_v23 = vpop.f32.mrf.mxu0 }
 0x367   : > { %1113 = vmatpush.msra.mxu2 %v1095_v52  ;;  %v1127_v30 = vmul.f32 %v2053_v19, %v1095_v52 }
 0x369   : > { %1114 = vmatpush.msra.mxu2 %v2684_v18 }
 0x36a   : > { %1864 = vmatmul.msk.f32.vlgmr.msra.gmra.mxu2 %vm915_vm11, %v1096_v6  ;;  %v2057_v2 = vpop.eup %2056 }
 0x36b   : > { %v1134_v1 = vpop.permute.xlu2 %1133 }
 0x36c   : > { %v1138_v49 = vmul.f32 %v1136_v5, %v1134_v1  ;;  %v1259_v5 = vmul.f32 1.442695, %v1256_v33  ;;  %v1321_v1 = vrot.slane %v2880_v23, 1 }
 0x36e   : > { %v1140_v58 = vadd.f32 %v1138_v49, %v1127_v30  ;;  %2058 = vpow2.f32 %v1259_v5  ;;  %v3069_v49 = vperm.slane %v2648_v28, 6 }
 0x370   : > { %v1172_v18 = vmul.f32 %v2055_v0, %v1140_v58  ;;  %1158 = vmatpush.msrb.mxu2 %v1140_v58  ;;  %v1526_v58 = vmul.f32 %v3069_v49, %v2726_v41  ;;  %v1728_v49 = vld [vmem:[%s3051_s12 + $0x28] sm:$0xff] }
 0x372   : > { %v1185_v53 = vadd.f32 %v1183_v29, %v1172_v18  ;;  %1159 = vmatpush.msrb.mxu2 %v2693_v17  ;;  %v1304_v17 = vmul.f32 1.442695, %v1301_v25  ;;  %v1366_v18 = vrot.slane %v2880_v23, 2 }
 0x373   : > { %1865 = vmatmul.msk.f32.vlgmr.msrb.gmra.mxu2 %vm915_vm11, %v1141_v24  ;;  %v1529_v24 = vmul.f32 1.442695, %v1526_v58  ;;  %v1727_v58 = vld [vmem:[%s3051_s12 + $0x20] sm:$0xff] }
 0x374   : > { %1203 = vmatpush.msra.mxu0 %v1185_v53  ;;  %v1217_v45 = vmul.f32 %v2057_v2, %v1185_v53  ;;  %v1224_v63 = vpop.permute.xlu2 %1223  ;;  %2060 = vpow2.f32 %v1304_v17 }
 0x375   : > { %v1228_v16 = vmul.f32 %v1226_v31, %v1224_v63  ;;  %v1391_v31 = vmul.f32 %v1389_v57, %v2726_v41  ;;  %2062 = vpow2.f32 %v1349_v48  ;;  %v1318_v57 = vmul.f32 %v3066_v26, %v2752_v60  ;;  %v1584_v48 = vpop.permute.xlu1 %1583 }
 0x376   : > { %1204 = vmatpush.msra.mxu0 %v2707_v38  ;;  %v2059_v38 = vpop.eup %2058  ;;  %v3068_v60 = vperm.slane %v2704_v32, 2 }
 0x377   : > { %v1230_v21 = vadd.f32 %v1228_v16, %v1217_v45  ;;  %1866 = vmatmul.msk.f32.vlgmr.msra.gmra.mxu0 %vm915_vm11, %v1186_v7  ;;  %v1394_v39 = vmul.f32 1.442695, %v1391_v31  ;;  %v1411_v45 = vrot.slane %v2880_v23, 3  ;;  %v1539_v7 = vpop.permute.xlu0 %1538  ;;  %v1586_v31 = vperm.slane %v2704_v32, 7 }
 0x378   : > { %v1363_v6 = vmul.f32 %v3068_v60, %v2743_v34  ;;  %v1408_v34 = vmul.f32 %v1406_v37, %v2767_v13  ;;  %v1876_v60 = vmul.f32 -1.442695, %v2560_v9 }
 0x379   : > { %1248 = vmatpush.msra.mxu1 %v1230_v21  ;;  %v1262_v22 = vmul.f32 %v2059_v38, %v1230_v21  ;;  %2064 = vpow2.f32 %v1394_v39  ;;  %v1541_v21 = vperm.slane %v2704_v32, 6 }
 0x37a   : > { %v2061_v51 = vpop.eup %2060 }
 0x37b   : > { %1249 = vmatpush.msra.mxu1 %v2716_v56  ;;  %v1436_v56 = vmul.f32 %v1434_v40, %v2726_v41  ;;  %v2063_v40 = vpop.eup %2062 }
 0x37c   : > { %1867 = vmatmul.msk.f32.vlgmr.msra.gmra.mxu1 %vm915_vm11, %v1231_v61 }
 0x37d   : > { %v1269_v35 = vpop.permute.xlu2 %1268  ;;  %v1439_v52 = vmul.f32 1.442695, %v1436_v56 }
 0x37e   : > { %v1273_v3 = vmul.f32 %v1271_v54, %v1269_v35  ;;  %v3067_v54 = vperm.slane %v2648_v28, 5 }
 0x37f   : > { %2066 = vpow2.f32 %v1439_v52  ;;  %v2065_v33 = vpop.eup %2064  ;;  %v1591_v52 = vrot.slane %v2880_v23, 7 }
 0x380   : > { %v1275_v47 = vadd.f32 %v1273_v3, %v1262_v22  ;;  %v1481_v8 = vmul.f32 %v3067_v54, %v2726_v41  ;;  %v1737_v54 = vld [vmem:[%s3051_s12 + $0x70] sm:$0xff] }
 0x382   : > { %v1307_v11 = vmul.f32 %v2061_v51, %v1275_v47  ;;  %1293 = vmatpush.msra.mxu2 %v1275_v47  ;;  %v1484_v30 = vmul.f32 1.442695, %v1481_v8  ;;  %v1546_v51 = vrot.slane %v2880_v23, 6  ;;  %v1736_v8 = vld [vmem:[%s3051_s12 + $0x68] sm:$0xff] }
 0x384   : > { %v1320_v50 = vadd.f32 %v1318_v57, %v1307_v11  ;;  %1294 = vmatpush.msra.mxu2 %v2731_v14  ;;  %v1569_v14 = vperm.slane %v2648_v28, 7  ;;  %2068 = vpow2.f32 %v1484_v30 }
 0x385   : > { %1868 = vmatmul.msk.f32.vlgmr.msra.gmra.mxu2 %vm915_vm11, %v2880_v23  ;;  %v2067_v28 = vpop.eup %2066  ;;  %2070 = vpow2.f32 %v1529_v24 }
 0x386   : > { %v1352_v20 = vmul.f32 %v2063_v40, %v1320_v50  ;;  %1338 = vmatpush.msra.mxu3 %v1320_v50  ;;  %v1449_v19 = vpop.permute.xlu2 %1448  ;;  %v1571_v53 = vmul.f32 %v1569_v14, %v2726_v41  ;;  %v1570_v37 = vmul.f32 %v1569_v14, %v2597_v36  ;;  %v1456_v36 = vrot.slane %v2880_v23, 4  ;;  %v1734_v50 = vld [vmem:[%s3051_s12 + $0x58] sm:$0xff]  ;;  %v1733_v40 = vld [vmem:[%s3051_s12 + $0x50] sm:$0xff] }
 0x387   : > { %v1453_v5 = vmul.f32 %v1451_v27, %v1449_v19  ;;  %v1730_v19 = vld [vmem:[%s3051_s12 + $0x38] sm:$0xff] }
 0x388   : > { %v1365_v0 = vadd.f32 %v1363_v6, %v1352_v20  ;;  %1339 = vmatpush.msra.mxu3 %v2746_v4  ;;  %v1574_v13 = vmul.f32 1.442695, %v1571_v53  ;;  %v1572_v27 = vmul.f32 1.442695, %v1570_v37  ;;  %v1732_v6 = vld [vmem:[%s3051_s12 + $0x48] sm:$0xff]  ;;  %v1731_v20 = vld [vmem:[%s3051_s12 + $0x40] sm:$0xff] }
 0x389   : > { %1869 = vmatmul.msk.f32.vlgmr.msra.gmra.mxu3 %vm915_vm11, %v1321_v1  ;;  %v1729_v1 = vld [vmem:[%s3051_s12 + $0x30] sm:$0xff] }
 0x38a   : > { %v1397_v29 = vmul.f32 %v2065_v33, %v1365_v0  ;;  %1383 = vmatpush.msrb.mxu0 %v1365_v0  ;;  %v2069_v41 = vpop.eup %2068  ;;  %2072 = vpow2.f32 %v1574_v13  ;;  %v1726_v33 = vld [vmem:[%s3051_s12 + $0x18] sm:$0xff] }
 0x38b   : > { %v2071_v59 = vpop.eup %2070  ;;  %2074 = vpow2.f32 %v1572_v27 }
 0x38c   : > { %v1410_v2 = vadd.f32 %v1408_v34, %v1397_v29  ;;  %1384 = vmatpush.msrb.mxu0 %v2772_v44  ;;  %2076 = vpow2.f32 %v1876_v60  ;;  %v1725_v34 = vld [vmem:[%s3051_s12 + $0x10] sm:$0xff]  ;;  %v1724_v29 = vld [vmem:[%s3051_s12 + $0x8] sm:$0xff] }
 0x38d   : > { %1870 = vmatmul.msk.f32.vlgmr.msrb.gmra.mxu0 %vm915_vm11, %v1366_v18  ;;  %v1723_v18 = vld [vmem:[%s3051_s12] sm:$0xff] }
 0x38e   : > { %v1442_v4 = vmul.f32 %v2067_v28, %v1410_v2  ;;  %1428 = vmatpush.msrb.mxu1 %v1410_v2 }
 0x38f   : > { %v1494_v25 = vpop.permute.xlu2 %1493 }
 0x390   : > { %v1455_v63 = vadd.f32 %v1453_v5, %v1442_v4  ;;  %1429 = vmatpush.msrb.mxu1 %v2786_v15  ;;  %v1498_v16 = vmul.f32 %v1496_v10, %v1494_v25  ;;  %v1543_v15 = vmul.f32 %v1541_v21, %v1539_v7  ;;  %v1501_v10 = vrot.slane %v2880_v23, 5  ;;  %v2073_v22 = vpop.eup %2072  ;;  %v1735_v23 = vld [vmem:[%s3051_s12 + $0x60] sm:$0xff] }
 0x391   : > { %1871 = vmatmul.msk.f32.vlgmr.msrb.gmra.mxu1 %vm915_vm11, %v1411_v45  ;;  %v2075_v47 = vpop.eup %2074 }
 0x392   : > { %v1487_v44 = vmul.f32 %v2069_v41, %v1455_v63  ;;  %1473 = vmatpush.msrb.mxu2 %v1455_v63  ;;  %v2077_v30 = vpop.eup %2076 }
 0x393   : > { %v1687_v14 = vadd.f32 1.0, %v2077_v30 }
 0x394   : > { %v1500_v17 = vadd.f32 %v1498_v16, %v1487_v44  ;;  %1474 = vmatpush.msrb.mxu2 %v2799_v43  ;;  %v1588_v43 = vmul.f32 %v1586_v31, %v1584_v48 }
 0x395   : > { %1872 = vmatmul.msk.f32.vlgmr.msrb.gmra.mxu2 %vm915_vm11, %v1456_v36  ;;  %2078 = vrcp.f32 %v1687_v14  ;;  %v1700_v16 = vand.u32 2147483648, %v1687_v14  ;;  %vm1694_vm1 = vweird.f32 %v1687_v14  ;;  %v1698_v36 = vand.u32 2147483647, %v1687_v14 }
 0x396   : > { %v1532_v61 = vmul.f32 %v2071_v59, %v1500_v17  ;;  %1518 = vmatpush.msrb.mxu3 %v1500_v17 }
 0x397   : > { %vm1699_vm5 = vcmp.eq.f32.partialorder %v1698_v36, 8.507059e+37 }
 0x398   : > { %v1545_v38 = vadd.f32 %v1543_v15, %v1532_v61  ;;  %v1535_v35 = vpop.permute.xlu2 %1534  ;;  %1519 = vmatpush.msrb.mxu3 %v2809_v42 }
 0x399   : > { %v1542_v3 = vmul.f32 %v1541_v21, %v1535_v35  ;;  %1873 = vmatmul.msk.f32.vlgmr.msrb.gmra.mxu3 %vm915_vm11, %v1501_v10  ;;  %v1983_v10 = vld [vmem:[%s3050_s11] ss:$0 sm:$0xff] }
 0x39a   : > { %v1577_v39 = vmul.f32 %v2073_v22, %v1545_v38  ;;  %1563 = vmatpush.msra.mxu0 %v1545_v38  ;;  %v1877_v38 = vmul.f32 -1.442695, %v2566_v12 }
 0x39b   : > { %v1544_v56 = vadd.f32 %v1542_v3, %v2816_v62  ;;  %v1738_v62 = vld [vmem:[%s3051_s12 + $0x78] sm:$0xff]  ;;  %v2079_v24 = vpop.eup %2078 }
 0x39c   : > { %v1590_v26 = vadd.f32 %v1588_v43, %v1577_v39  ;;  %1739 = vmatpush.msra.mxu2 %v1738_v62  ;;  %v1690_v2 = vmul.f32 %v2079_v24, %v1687_v14  ;;  %vm1695_vm12 = vweird.f32 %v2079_v24  ;;  %2080 = vpow2.f32 %v1877_v38 }
 0x39d   : > { %1564 = vmatpush.msra.mxu0 %v1544_v56  ;;  %v1576_v57 = vmul.f32 %v2075_v47, %v1544_v56  ;;  %vm2977_vm2 = vmor %vm1694_vm1, %vm1695_vm12 }
 0x39e   : > { %1874 = vmatmul.msk.f32.vlgmr.msra.gmra.mxu0 %vm915_vm11, %v1546_v51  ;;  %1608 = vmatpush.msra.mxu1 %v1590_v26  ;;  %v1691_v4 = vsub.f32 1.0, %v1690_v2  ;;  %v1677_v51 = vmul.f32 %v1983_v10, %v2527_v46 }
 0x39f   : > { %1740 = vmatpush.msra.mxu2 %v1737_v54 }
 0x3a0   : > { %v1692_v37 = vmul.f32 %v2079_v24, %v1691_v4 }
 0x3a1   : > { %v1580_v32 = vpop.permute.xlu2 %1579  ;;  %1741 = vmatpush.msra.mxu2 %v1736_v8 }
 0x3a2   : > { %v1587_v42 = vmul.f32 %v1586_v31, %v1580_v32  ;;  %v1693_v63 = vadd.f32 %v2079_v24, %v1692_v37  ;;  %v1701_v31 = vor.u32 1.1754944e-38, %v1700_v16 }
 0x3a3   : > { %1742 = vmatpush.msra.mxu2 %v1735_v23 }
 0x3a4   : > { %v1589_v11 = vadd.f32 %v1587_v42, %v1576_v57  ;;  %v1697_v15 = vsel %vm2977_vm2, %v2079_v24, %v1693_v63 }
 0x3a5   : > { %1743 = vmatpush.msra.mxu2 %v1734_v50  ;;  %v1702_v39 = vsel %vm1699_vm5, %v1701_v31, %v1697_v15 }
 0x3a6   : > { %1609 = vmatpush.msra.mxu1 %v1589_v11  ;;  %v1719_v57 = vmul.f32 %v1702_v39, %v2560_v9  ;;  %v2081_v11 = vpop.eup %2080 }
 0x3a7   : > { %1875 = vmatmul.msk.f32.vlgmr.msra.gmra.mxu1 %vm915_vm11, %v1591_v52  ;;  %1744 = vmatpush.msra.mxu2 %v1733_v40  ;;  %v1688_v52 = vadd.f32 1.0, %v2081_v11 }
 0x3a9   : > { %1745 = vmatpush.msra.mxu2 %v1732_v6  ;;  %2082 = vrcp.f32 %v1688_v52  ;;  %vm1709_vm8 = vweird.f32 %v1688_v52 }
 0x3ab   : > { %1746 = vmatpush.msra.mxu2 %v1731_v20 }
 0x3ad   : > { %1747 = vmatpush.msra.mxu2 %v1730_v19 }
 0x3af   : > { %1748 = vmatpush.msra.mxu2 %v1729_v1  ;;  %v2083_v62 = vpop.eup %2082 }
 0x3b0   : > { %v1705_v54 = vmul.f32 %v2083_v62, %v1688_v52  ;;  %vm1710_vm7 = vweird.f32 %v2083_v62 }
 0x3b1   : > { %1749 = vmatpush.msra.mxu2 %v1728_v49  ;;  %vm1711_vm10 = vmor %vm1709_vm8, %vm1710_vm7 }
 0x3b2   : > { %v1706_v50 = vsub.f32 1.0, %v1705_v54 }
 0x3b3   : > { %1750 = vmatpush.msra.mxu2 %v1727_v58 }
 0x3b4   : > { %v1707_v6 = vmul.f32 %v2083_v62, %v1706_v50 }
 0x3b5   : > { %1751 = vmatpush.msra.mxu2 %v1726_v33 }
 0x3b6   : > { %v1708_v49 = vadd.f32 %v2083_v62, %v1707_v6 }
 0x3b7   : > { %1752 = vmatpush.msra.mxu2 %v1725_v34  ;;  %v1713_v34 = vand.u32 2147483647, %v1688_v52 }
 0x3b8   : > { %v1712_v24 = vsel %vm1711_vm10, %v2083_v62, %v1708_v49 }
 0x3b9   : > { %1753 = vmatpush.msra.mxu2 %v1724_v29 }
 0x3bb   : > { %1754 = vmatpush.msra.mxu2 %v1723_v18 }
 0x3cc   : > { %v936_v28 = vpop.f32.mrf.mxu1 }
 0x3d6   : > { %v981_v0 = vpop.f32.mrf.mxu2 }
 0x3d7   : > { %v1615_v13 = vrot.slane %v981_v0, 7  ;;  %v1715_v0 = vand.u32 2147483648, %v1688_v52 }
 0x3d9   : > { %v1656_v41 = vsel %vm610_vm15, %v936_v28, %v1615_v13  ;;  %v1716_v2 = vor.u32 1.1754944e-38, %v1715_v0 }
 0x3de   : > { %v1026_v53 = vpop.f32.mrf.mxu2  ;;  %v1071_v45 = vpop.f32.mrf.mxu1 }
 0x3df   : > { %v1618_v25 = vrot.slane %v1026_v53, 6  ;;  %v1621_v44 = vrot.slane %v1071_v45, 5  ;;  %v1678_v45 = vmul.f32 %v1983_v10, %v2531_v55 }
 0x3e1   : > { %v1657_v27 = vsel %vm597_vm14, %v1656_v41, %v1618_v25 }
 0x3e2   : > { %v1658_v61 = vsel %vm584_vm13, %v1657_v27, %v1621_v44 }
 0x3ed   : > { %v1116_v5 = vpop.f32.mrf.mxu2 }
 0x3ee   : > { %v1624_v7 = vrot.slane %v1116_v5, 4 }
 0x3f0   : > { %v1659_v35 = vsel %vm804_vm9, %v1658_v61, %v1624_v7  ;;  %v2084_v7 = vld [vmem:[%s2291_s24] sm:$0xff] }
 0x3f4   : > { %v1206_v21 = vpop.f32.mrf.mxu0 }
 0x3f5   : > { %v1630_v22 = vrot.slane %v1206_v21, 2 }
 0x3f6   : > { %v1161_v59 = vpop.f32.mrf.mxu2 }
 0x3f7   : > { %v1627_v48 = vrot.slane %v1161_v59, 3 }
 0x3f9   : > { %v1661_v3 = vsel %vm1660_vm3, %v1659_v35, %v1627_v48  ;;  %v1251_v43 = vpop.f32.mrf.mxu1 }
 0x3fa   : > { %v1633_v56 = vrot.slane %v1251_v43, 1  ;;  %v1663_v47 = vsel %vm1662_vm4, %v1661_v3, %v1630_v22 }
 0x3fc   : > { %v1665_v26 = vsel %vm1664_vm6, %v1663_v47, %v1633_v56 }
 0x3fd   : > { %v1679_v32 = vadd.f32 %v1677_v51, %v1665_v26 }
 0x3ff   : > { %v1721_v42 = vmul.f32 %v1719_v57, %v1679_v32 }
 0x401   : > { %1755 = vmatmul.f32.vlgmr.msra.gmra.mxu2 %v1721_v42 }
 0x408   : > { %v1296_v8 = vpop.f32.mrf.mxu2 }
 0x40a   : > { %v1386_v60 = vpop.f32.mrf.mxu0 }
 0x40b   : > { %v1639_v1 = vrot.slane %v1386_v60, 6 }
 0x40c   : > { %v1341_v23 = vpop.f32.mrf.mxu3 }
 0x40d   : > { %v1636_v40 = vrot.slane %v1341_v23, 7 }
 0x40e   : > { %v1431_v46 = vpop.f32.mrf.mxu1 }
 0x40f   : > { %v1666_v20 = vsel %vm610_vm15, %v1296_v8, %v1636_v40  ;;  %v1642_v30 = vrot.slane %v1431_v46, 5  ;;  %vm1714_vm15 = vcmp.eq.f32.partialorder %v1713_v34, 8.507059e+37 }
 0x410   : > { %v1667_v58 = vsel %vm597_vm14, %v1666_v20, %v1639_v1  ;;  %v1717_v37 = vsel %vm1714_vm15, %v1716_v2, %v1712_v24 }
 0x411   : > { %v1668_v29 = vsel %vm584_vm13, %v1667_v58, %v1642_v30  ;;  %v1720_v41 = vmul.f32 %v1717_v37, %v2566_v12  ;;  %v2085_v12 = vld [vmem:[%s2291_s24 + $0x8] sm:$0xff] }
 0x418   : > { %v1476_v19 = vpop.f32.mrf.mxu2 }
 0x419   : > { %v1645_v14 = vrot.slane %v1476_v19, 4 }
 0x41b   : > { %v1566_v18 = vpop.f32.mrf.mxu0  ;;  %v1669_v53 = vsel %vm804_vm9, %v1668_v29, %v1645_v14 }
 0x41c   : > { %v1521_v9 = vpop.f32.mrf.mxu3  ;;  %v1651_v4 = vrot.slane %v1566_v18, 2 }
 0x41d   : > { %v1648_v33 = vrot.slane %v1521_v9, 3 }
 0x41f   : > { %v1670_v28 = vsel %vm1660_vm3, %v1669_v53, %v1648_v33 }
 0x420   : > { %v1671_v25 = vsel %vm1662_vm4, %v1670_v28, %v1651_v4 }
 0x424   : > { %v1611_v5 = vpop.f32.mrf.mxu1 }
 0x425   : > { %v1654_v13 = vrot.slane %v1611_v5, 1 }
 0x427   : > { %v1672_v63 = vsel %vm1664_vm6, %v1671_v25, %v1654_v13 }
 0x428   : > { %v1680_v44 = vadd.f32 %v1678_v45, %v1672_v63 }
 0x42a   : > { %v1722_v16 = vmul.f32 %v1720_v41, %v1680_v44 }
 0x42c   : > { %1758 = vmatmul.f32.gmra.mxu2 %v1722_v16 }
 0x484   : > { %v1756_v27 = vpop.f32.mrf.mxu2 }
 0x485   : > { %v1762_v36 = vadd.f32 %v2084_v7, %v1756_v27 }
 0x487   : > { %1764 = vst.msk [vmem:[%s433_s21] sm:$0xff] %vm443_vm0, %v1762_v36 }
 0x4af   : > { %v1759_v55 = vpop.f32.mrf.mxu2 }
 0x4b0   : > { %v1763_v21 = vadd.f32 %v2085_v12, %v1759_v55 }
 0x4b2   : > { %1765 = vst.msk [vmem:[%s433_s21 + $0x8] sm:$0xff] %vm443_vm0, %v1763_v21 }
 0x4b3   : > { %2113 = shalt.err (!%p2110_p3)
}
 0x4b4   : > { %s2166_s24 = smov 128   ;;  %s2167_s16 = smov 8  }
 0x4b5   : > { %1885 = dma.vmem_to_hbm [thread:$0]  (%p2276_p5), %s1780_s17, 256, %s1782_s30, %s1767_s15, %s2166_s24, %s2166_s24, %s2167_s16  }
 0x4b6 PF: > { %p1891_p4 = scmp.ge.s32.totalorder %s2148_s28, 2  ;;  %s1796_s21 = sand.u32 1, %s2136_s25  }
 0x4b7   : > { %s1797_s29 = scalar_lea.sflag [#allocation3], %s1796_s21 }
 0x4b8   : > { %p1888_p7 = pnand %p1891_p4, %p2280_p6 }
 0x4ba   : > { %p1889_p8 = pneg %p1888_p7 }
 0x4bc   : > { %2131 = dma.done.wait (%p1889_p8), %s1797_s29, 256  }
 0x4bd   : > { %2133 = vsyncadd (%p1889_p8), %s1797_s29, 4294967040  ;;  %s3072_s1 = sld [smem:[#allocation5_spill]]  ;;  %p23_p9 = scmp.ge.s32.totalorder %s2263_s14, 4  }
 0x4be   : > { %s3073_s27 = sld [smem:[#allocation6_spill]]  ;;  %s3074_s25 = smov %s2140_s26 }
 0x4bf   : > { %s3076_s28 = smov %s2263_s14  ;;  %25 = sbr.rel (!%p23_p9) target bundleno = 6 (0x6), region = 107 }
 0x4c3   : > { %s3075_s26 = smov %s3072_s1 }
 0x4c4   :  { %1803 = vsyncpa [#allocation3], 1 }
 0x4c5   :  { %1805 = vsyncpa [#allocation3 + $0x1], 1 }

</bundles_post_ra>
